<compile_context>
chip_gen: v7x
topology: tpu7x:2x2x1
jax: 0.10.0
libtpu: 0.0.40
codegen_flags: <defaults>
</compile_context>

<pallas_src>
import functools

import jax
import jax.numpy as jnp
from jax import lax
from jax.experimental import pallas as pl
from jax.experimental.pallas import tpu as pltpu

FILTERS = 96     # logical conv / linear width of the PyTorch module
CPAD = 128       # lane-padded channel width used inside the kernel
VPAD = 128       # lane-padded vocabulary for the one-hot embedding matmul


# ----------------------------------------------------------------------------
# Fused kernel: embedding gather + all StackCNN blocks + max-pools + Linear
# ----------------------------------------------------------------------------
def _target_repr_kernel(tok_ref, embed_ref, *refs, block_num, ksize, rows):
    """Processes `rows` batch rows per grid step, fully fused in VMEM.

    refs layout: for each block b, for each of its (b+1) conv layers:
      (w_taps (ksize, cin, CPAD) bf16, bias (1, CPAD) f32)
    then (lin_w (block_num*CPAD, CPAD) bf16, lin_b (1, CPAD) f32), then o_ref.
    """
    o_ref = refs[-1]
    wrefs = refs[:-1]
    seq_len = tok_ref.shape[1]

    def row_body(r, carry):
        # --- embedding gather as a one-hot matmul (padding_idx row is zero) ---
        tok = tok_ref[r]                                             # (L, 1) int32
        eq = tok == lax.broadcasted_iota(jnp.int32, (seq_len, VPAD), 1)
        onehot = jnp.where(eq, 1.0, 0.0).astype(jnp.bfloat16)        # (L, VPAD)
        x = jnp.dot(onehot, embed_ref[...],
                    preferred_element_type=jnp.float32)              # (L, E) f32

        feats = []
        idx = 0
        for b in range(block_num):
            h = x
            l_cur = seq_len
            for _ in range(b + 1):
                w_ref = wrefs[idx]          # (ksize, cin, CPAD) bf16
                b_ref = wrefs[idx + 1]      # (1, CPAD) f32
                idx += 2
                l_out = l_cur - ksize + 1
                # Per-tap accumulation (no im2col): bf16 operands, f32 accum.
                acc = jnp.dot(h[0:l_out, :].astype(jnp.bfloat16), w_ref[0],
                              preferred_element_type=jnp.float32)
                for k in range(1, ksize):
                    acc = acc + jnp.dot(
                        h[k:k + l_out, :].astype(jnp.bfloat16), w_ref[k],
                        preferred_element_type=jnp.float32)
                h = jnp.maximum(acc + b_ref[...], 0.0)               # f32 epilogue
                l_cur = l_out
            # AdaptiveMaxPool1d(1).squeeze(-1): max over the length axis.
            feats.append(jnp.max(h, axis=0, keepdims=True))          # (1, CPAD)

        lin_w_ref = wrefs[idx]
        lin_b_ref = wrefs[idx + 1]
        feat = jnp.concatenate(feats, axis=1).astype(jnp.bfloat16)   # (1, bn*CPAD)
        y = jnp.dot(feat, lin_w_ref[...],
                    preferred_element_type=jnp.float32) + lin_b_ref[...]
        o_ref[pl.ds(r, 1), :] = y                                    # 128-lane dense store
        return carry

    lax.fori_loop(0, rows, row_body, 0)


def _const_map(ndim):
    return lambda i: (0,) * ndim


# ----------------------------------------------------------------------------
# Parameter re-layout: PyTorch layout -> padded bf16 kernel layout
# ----------------------------------------------------------------------------
def prepare_kernel_params(params, block_num, ksize):
    emb = params["embed"]                                    # (vocab, E) f32, row 0 = 0
    vocab, emb_dim = emb.shape
    embed_p = jnp.zeros((VPAD, emb_dim), jnp.float32).at[:vocab].set(emb)

    flat = []
    for block in params["blocks"]:
        for li, layer in enumerate(block):
            w = layer["w"]                                   # PyTorch Conv1d: (cout, cin, k)
            cout, cin, _ = w.shape
            cin_k = cin if li == 0 else CPAD                 # deeper layers consume padded 128
            w_taps = jnp.transpose(w, (2, 1, 0))             # (ksize, cin, cout), k-major taps
            w_pad = jnp.zeros((ksize, cin_k, CPAD), jnp.float32)
            w_pad = w_pad.at[:, :cin, :cout].set(w_taps)
            b_pad = jnp.zeros((1, CPAD), jnp.float32).at[0, :cout].set(layer["b"])
            flat += [w_pad.astype(jnp.bfloat16), b_pad]

    # PyTorch Linear: weight (96, block_num*96), y = x @ W.T + b.
    lin_w_t = params["lin_w"].T                              # (block_num*96, 96)
    lw = jnp.zeros((block_num * CPAD, CPAD), jnp.float32)
    for b in range(block_num):
        lw = lw.at[b * CPAD:b * CPAD + FILTERS, :FILTERS].set(
            lin_w_t[b * FILTERS:(b + 1) * FILTERS, :])
    lb = jnp.zeros((1, CPAD), jnp.float32).at[0, :FILTERS].set(params["lin_b"])
    flat += [lw.astype(jnp.bfloat16), lb]
    return embed_p.astype(jnp.bfloat16), flat


# ----------------------------------------------------------------------------
# Wrapper
# ----------------------------------------------------------------------------
def target_representation_forward(params, tokens, block_num, ksize=3):
    bsz, seq_len = tokens.shape
    assert seq_len >= block_num * (ksize - 1) + 1, "sequence too short for valid convs"

    embed_p, flat = prepare_kernel_params(params, block_num, ksize)
    emb_dim = embed_p.shape[1]

    rows = bsz if bsz <= 8 else 8                            # R rows per grid step
    b_pad = ((bsz + rows - 1) // rows) * rows
    tok = tokens.astype(jnp.int32)
    if b_pad != bsz:
        tok = jnp.pad(tok, ((0, b_pad - bsz), (0, 0)))       # pad with token 0 (zero embed row)
    tok = tok.reshape(b_pad, seq_len, 1)                     # column layout for lane-broadcast

    # Advisory cost estimate for the XLA scheduler.
    flops_row = 2 * seq_len * VPAD * emb_dim
    for b in range(block_num):
        l_cur, cin = seq_len, emb_dim
        for _ in range(b + 1):
            l_out = l_cur - ksize + 1
            flops_row += 2 * l_out * ksize * cin * CPAD
            cin, l_cur = CPAD, l_out
    flops_row += 2 * block_num * CPAD * CPAD
    weight_bytes = sum(int(w.size) * w.dtype.itemsize for w in flat)
    weight_bytes += int(embed_p.size) * 2
    bytes_accessed = int(tok.size) * 4 + weight_bytes + b_pad * CPAD * 4

    kernel = functools.partial(_target_repr_kernel,
                               block_num=block_num, ksize=ksize, rows=rows)

    in_specs = [pl.BlockSpec((rows, seq_len, 1), lambda i: (i, 0, 0)),
                pl.BlockSpec(embed_p.shape, _const_map(embed_p.ndim))]
    in_specs += [pl.BlockSpec(w.shape, _const_map(w.ndim)) for w in flat]

    out = pl.pallas_call(
        kernel,
        out_shape=jax.ShapeDtypeStruct((b_pad, CPAD), jnp.float32),
        grid=(b_pad // rows,),
        in_specs=in_specs,
        out_specs=pl.BlockSpec((rows, CPAD), lambda i: (i, 0)),
        compiler_params=pltpu.CompilerParams(
            dimension_semantics=("parallel",),
            vmem_limit_bytes=32 * 1024 * 1024),
        cost_estimate=pl.CostEstimate(
            flops=int(flops_row) * int(b_pad),
            transcendentals=0,
            bytes_accessed=int(bytes_accessed)),
    )(tok, embed_p, *flat)
    return out[:bsz, :FILTERS]


# ----------------------------------------------------------------------------
# Deterministic parameters (PyTorch layouts) + pure-JAX f32 reference
# ----------------------------------------------------------------------------
def make_params(key, block_num, vocab_size, embedding_num, filters=FILTERS, ksize=3):
    keys = iter(jax.random.split(key, 64))

    def dense(shape, fan_in):
        return (1.0 / jnp.sqrt(jnp.float32(fan_in))) * jax.random.normal(
            next(keys), shape, jnp.float32)

    embed = dense((vocab_size, embedding_num), embedding_num)
    embed = embed.at[0].set(0.0)                             # padding_idx=0
    blocks = []
    for bi in range(block_num):
        layers = []
        cin = embedding_num
        for _ in range(bi + 1):
            layers.append(dict(
                w=dense((filters, cin, ksize), cin * ksize),         # Conv1d (cout, cin, k)
                b=0.01 * jax.random.normal(next(keys), (filters,), jnp.float32)))
            cin = filters
        blocks.append(layers)
    lin_w = dense((filters, block_num * filters), block_num * filters)  # Linear (out, in)
    lin_b = 0.01 * jax.random.normal(next(keys), (filters,), jnp.float32)
    return dict(embed=embed, blocks=blocks, lin_w=lin_w, lin_b=lin_b)


def reference_forward(params, tokens, block_num, ksize=3):
    x = jnp.take(params["embed"], tokens, axis=0)            # (B, L, E) channels-last
    feats = []
    for block in params["blocks"]:
        h = x
        for layer in block:
            w, b = layer["w"], layer["b"]                    # (cout, cin, k), (cout,)
            l_out = h.shape[1] - ksize + 1
            y = jnp.zeros((h.shape[0], l_out, w.shape[0]), jnp.float32)
            for k in range(ksize):
                y = y + jnp.einsum("blc,oc->blo", h[:, k:k + l_out, :], w[:, :, k])
            h = jax.nn.relu(y + b)
        feats.append(jnp.max(h, axis=1))                     # (B, 96)
    feat = jnp.concatenate(feats, axis=-1)
    return feat @ params["lin_w"].T + params["lin_b"]


# ----------------------------------------------------------------------------
# Main
# ----------------------------------------------------------------------------
if __name__ == "__main__":
    block_num = 3
    vocab_protein_size = 26          # 25 amino-acid tokens + padding index 0
    embedding_num = 128
    batch, seq_len = 2, 16

    params = make_params(jax.random.PRNGKey(0), block_num,
                         vocab_protein_size, embedding_num)
    tokens = jax.random.randint(jax.random.PRNGKey(0), (batch, seq_len),
                                0, vocab_protein_size)

    fwd = jax.jit(functools.partial(target_representation_forward,
                                    block_num=block_num))
    out = jax.block_until_ready(fwd(params, tokens))
    assert out.shape == (batch, FILTERS), out.shape
    assert bool(jnp.all(jnp.isfinite(out)))

    ref = reference_forward(params, tokens, block_num)
    err = float(jnp.max(jnp.abs(out - ref)))
    assert err < 3e-2, f"max abs err vs f32 reference: {err}"
    print("KERNEL_OK")
</pallas_src>

<mosaic_0001>
module attributes {stable_mosaic.version = 11 : i64} {
  func.func @_target_repr_kernel(%arg0: i32, %arg1: memref<2x16x1xi32, #tpu.memory_space<vmem>>, %arg2: memref<128x128xbf16, #tpu.memory_space<vmem>>, %arg3: memref<3x128x128xbf16, #tpu.memory_space<vmem>>, %arg4: memref<1x128xf32, #tpu.memory_space<vmem>>, %arg5: memref<3x128x128xbf16, #tpu.memory_space<vmem>>, %arg6: memref<1x128xf32, #tpu.memory_space<vmem>>, %arg7: memref<3x128x128xbf16, #tpu.memory_space<vmem>>, %arg8: memref<1x128xf32, #tpu.memory_space<vmem>>, %arg9: memref<3x128x128xbf16, #tpu.memory_space<vmem>>, %arg10: memref<1x128xf32, #tpu.memory_space<vmem>>, %arg11: memref<3x128x128xbf16, #tpu.memory_space<vmem>>, %arg12: memref<1x128xf32, #tpu.memory_space<vmem>>, %arg13: memref<3x128x128xbf16, #tpu.memory_space<vmem>>, %arg14: memref<1x128xf32, #tpu.memory_space<vmem>>, %arg15: memref<384x128xbf16, #tpu.memory_space<vmem>>, %arg16: memref<1x128xf32, #tpu.memory_space<vmem>>, %arg17: memref<2x128xf32, #tpu.memory_space<vmem>>) attributes {dimension_semantics = [#tpu.dimension_semantics<parallel>], iteration_bounds = array<i64: 1>, scalar_prefetch = 0 : i64, scratch_operands = 0 : i64, tpu.core_type = #tpu.core_type<tc>, window_params = [{transform_indices = @transform_0, window_bounds = array<i64: 2, 16, 1>}, {pipeline_mode = #tpu.pipeline_mode<synchronous>, transform_indices = @transform_1, window_bounds = array<i64: 128, 128>}, {pipeline_mode = #tpu.pipeline_mode<synchronous>, transform_indices = @transform_2, window_bounds = array<i64: 3, 128, 128>}, {pipeline_mode = #tpu.pipeline_mode<synchronous>, transform_indices = @transform_3, window_bounds = array<i64: 1, 128>}, {pipeline_mode = #tpu.pipeline_mode<synchronous>, transform_indices = @transform_4, window_bounds = array<i64: 3, 128, 128>}, {pipeline_mode = #tpu.pipeline_mode<synchronous>, transform_indices = @transform_5, window_bounds = array<i64: 1, 128>}, {pipeline_mode = #tpu.pipeline_mode<synchronous>, transform_indices = @transform_6, window_bounds = array<i64: 3, 128, 128>}, {pipeline_mode = #tpu.pipeline_mode<synchronous>, transform_indices = @transform_7, window_bounds = array<i64: 1, 128>}, {pipeline_mode = #tpu.pipeline_mode<synchronous>, transform_indices = @transform_8, window_bounds = array<i64: 3, 128, 128>}, {pipeline_mode = #tpu.pipeline_mode<synchronous>, transform_indices = @transform_9, window_bounds = array<i64: 1, 128>}, {pipeline_mode = #tpu.pipeline_mode<synchronous>, transform_indices = @transform_10, window_bounds = array<i64: 3, 128, 128>}, {pipeline_mode = #tpu.pipeline_mode<synchronous>, transform_indices = @transform_11, window_bounds = array<i64: 1, 128>}, {pipeline_mode = #tpu.pipeline_mode<synchronous>, transform_indices = @transform_12, window_bounds = array<i64: 3, 128, 128>}, {pipeline_mode = #tpu.pipeline_mode<synchronous>, transform_indices = @transform_13, window_bounds = array<i64: 1, 128>}, {pipeline_mode = #tpu.pipeline_mode<synchronous>, transform_indices = @transform_14, window_bounds = array<i64: 384, 128>}, {pipeline_mode = #tpu.pipeline_mode<synchronous>, transform_indices = @transform_15, window_bounds = array<i64: 1, 128>}, {transform_indices = @transform_16, window_bounds = array<i64: 2, 128>}]} {
    %c0_i32 = arith.constant 0 : i32
    %c2_i32 = arith.constant 2 : i32
    %0 = arith.addi %c0_i32, %c2_i32 : i32
    %c1_i32 = arith.constant 1 : i32
    scf.for %arg18 = %c0_i32 to %0 step %c1_i32  : i32 {
      %1 = arith.index_cast %arg18 : i32 to index
      %c0 = arith.constant 0 : index
      %c0_1 = arith.constant 0 : index
      %2 = vector.load %arg1[%1, %c0, %c0_1] : memref<2x16x1xi32, #tpu.memory_space<vmem>>, vector<1x16x1xi32>
      %3 = vector.shape_cast %2 : vector<1x16x1xi32> to vector<16x1xi32>
      %4 = tpu.iota {dimensions = array<i32: 1>} : vector<16x128xi32>
      %5 = vector.broadcast %3 : vector<16x1xi32> to vector<16x128xi32>
      %6 = arith.cmpi eq, %5, %4 : vector<16x128xi32>
      %cst = arith.constant 1.000000e+00 : f32
      %cst_2 = arith.constant 0.000000e+00 : f32
      %7 = vector.broadcast %cst : f32 to vector<16x128xf32>
      %8 = vector.broadcast %cst_2 : f32 to vector<16x128xf32>
      %9 = arith.select %6, %7, %8 : vector<16x128xi1>, vector<16x128xf32>
      %10 = arith.truncf %9 : vector<16x128xf32> to vector<16x128xbf16>
      %c0_3 = arith.constant 0 : index
      %c0_4 = arith.constant 0 : index
      %11 = vector.load %arg2[%c0_3, %c0_4] : memref<128x128xbf16, #tpu.memory_space<vmem>>, vector<128x128xbf16>
      %cst_5 = arith.constant dense<0.000000e+00> : vector<16x128xf32>
      %12 = tpu.matmul %10, %11, %cst_5 {dimension_numbers = #tpu.dot_dimension_numbers<[1], [0], [0], [1], [0, 0, 1, 1], [], []>} : vector<16x128xbf16>, vector<128x128xbf16>, vector<16x128xf32> -> vector<16x128xf32>
      %13 = vector.extract_strided_slice %12 {offsets = [0, 0], sizes = [14, 128], strides = [1, 1]} : vector<16x128xf32> to vector<14x128xf32>
      %14 = arith.truncf %13 : vector<14x128xf32> to vector<14x128xbf16>
      %c0_6 = arith.constant 0 : index
      %c0_7 = arith.constant 0 : index
      %c0_8 = arith.constant 0 : index
      %15 = vector.load %arg3[%c0_6, %c0_7, %c0_8] : memref<3x128x128xbf16, #tpu.memory_space<vmem>>, vector<1x128x128xbf16>
      %16 = vector.shape_cast %15 : vector<1x128x128xbf16> to vector<128x128xbf16>
      %cst_9 = arith.constant dense<0.000000e+00> : vector<14x128xf32>
      %17 = tpu.matmul %14, %16, %cst_9 {dimension_numbers = #tpu.dot_dimension_numbers<[1], [0], [0], [1], [0, 0, 1, 1], [], []>} : vector<14x128xbf16>, vector<128x128xbf16>, vector<14x128xf32> -> vector<14x128xf32>
      %18 = vector.extract_strided_slice %12 {offsets = [1, 0], sizes = [14, 128], strides = [1, 1]} : vector<16x128xf32> to vector<14x128xf32>
      %19 = arith.truncf %18 : vector<14x128xf32> to vector<14x128xbf16>
      %c1 = arith.constant 1 : index
      %c0_10 = arith.constant 0 : index
      %c0_11 = arith.constant 0 : index
      %20 = vector.load %arg3[%c1, %c0_10, %c0_11] : memref<3x128x128xbf16, #tpu.memory_space<vmem>>, vector<1x128x128xbf16>
      %21 = vector.shape_cast %20 : vector<1x128x128xbf16> to vector<128x128xbf16>
      %cst_12 = arith.constant dense<0.000000e+00> : vector<14x128xf32>
      %22 = tpu.matmul %19, %21, %cst_12 {dimension_numbers = #tpu.dot_dimension_numbers<[1], [0], [0], [1], [0, 0, 1, 1], [], []>} : vector<14x128xbf16>, vector<128x128xbf16>, vector<14x128xf32> -> vector<14x128xf32>
      %23 = arith.addf %17, %22 : vector<14x128xf32>
      %24 = vector.extract_strided_slice %12 {offsets = [2, 0], sizes = [14, 128], strides = [1, 1]} : vector<16x128xf32> to vector<14x128xf32>
      %25 = arith.truncf %24 : vector<14x128xf32> to vector<14x128xbf16>
      %c2 = arith.constant 2 : index
      %c0_13 = arith.constant 0 : index
      %c0_14 = arith.constant 0 : index
      %26 = vector.load %arg3[%c2, %c0_13, %c0_14] : memref<3x128x128xbf16, #tpu.memory_space<vmem>>, vector<1x128x128xbf16>
      %27 = vector.shape_cast %26 : vector<1x128x128xbf16> to vector<128x128xbf16>
      %cst_15 = arith.constant dense<0.000000e+00> : vector<14x128xf32>
      %28 = tpu.matmul %25, %27, %cst_15 {dimension_numbers = #tpu.dot_dimension_numbers<[1], [0], [0], [1], [0, 0, 1, 1], [], []>} : vector<14x128xbf16>, vector<128x128xbf16>, vector<14x128xf32> -> vector<14x128xf32>
      %29 = arith.addf %23, %28 : vector<14x128xf32>
      %c0_16 = arith.constant 0 : index
      %c0_17 = arith.constant 0 : index
      %30 = vector.load %arg4[%c0_16, %c0_17] : memref<1x128xf32, #tpu.memory_space<vmem>>, vector<1x128xf32>
      %31 = vector.broadcast %30 : vector<1x128xf32> to vector<14x128xf32>
      %32 = arith.addf %29, %31 : vector<14x128xf32>
      %cst_18 = arith.constant 0.000000e+00 : f32
      %33 = vector.broadcast %cst_18 : f32 to vector<14x128xf32>
      %34 = arith.maximumf %32, %33 : vector<14x128xf32>
      %cst_19 = arith.constant dense<0xFF800000> : vector<128xf32>
      %35 = vector.multi_reduction <maximumf>, %34, %cst_19 [0] : vector<14x128xf32> to vector<128xf32>
      %36 = vector.shape_cast %35 : vector<128xf32> to vector<1x128xf32>
      %37 = vector.extract_strided_slice %12 {offsets = [0, 0], sizes = [14, 128], strides = [1, 1]} : vector<16x128xf32> to vector<14x128xf32>
      %38 = arith.truncf %37 : vector<14x128xf32> to vector<14x128xbf16>
      %c0_20 = arith.constant 0 : index
      %c0_21 = arith.constant 0 : index
      %c0_22 = arith.constant 0 : index
      %39 = vector.load %arg5[%c0_20, %c0_21, %c0_22] : memref<3x128x128xbf16, #tpu.memory_space<vmem>>, vector<1x128x128xbf16>
      %40 = vector.shape_cast %39 : vector<1x128x128xbf16> to vector<128x128xbf16>
      %cst_23 = arith.constant dense<0.000000e+00> : vector<14x128xf32>
      %41 = tpu.matmul %38, %40, %cst_23 {dimension_numbers = #tpu.dot_dimension_numbers<[1], [0], [0], [1], [0, 0, 1, 1], [], []>} : vector<14x128xbf16>, vector<128x128xbf16>, vector<14x128xf32> -> vector<14x128xf32>
      %42 = vector.extract_strided_slice %12 {offsets = [1, 0], sizes = [14, 128], strides = [1, 1]} : vector<16x128xf32> to vector<14x128xf32>
      %43 = arith.truncf %42 : vector<14x128xf32> to vector<14x128xbf16>
      %c1_24 = arith.constant 1 : index
      %c0_25 = arith.constant 0 : index
      %c0_26 = arith.constant 0 : index
      %44 = vector.load %arg5[%c1_24, %c0_25, %c0_26] : memref<3x128x128xbf16, #tpu.memory_space<vmem>>, vector<1x128x128xbf16>
      %45 = vector.shape_cast %44 : vector<1x128x128xbf16> to vector<128x128xbf16>
      %cst_27 = arith.constant dense<0.000000e+00> : vector<14x128xf32>
      %46 = tpu.matmul %43, %45, %cst_27 {dimension_numbers = #tpu.dot_dimension_numbers<[1], [0], [0], [1], [0, 0, 1, 1], [], []>} : vector<14x128xbf16>, vector<128x128xbf16>, vector<14x128xf32> -> vector<14x128xf32>
      %47 = arith.addf %41, %46 : vector<14x128xf32>
      %48 = vector.extract_strided_slice %12 {offsets = [2, 0], sizes = [14, 128], strides = [1, 1]} : vector<16x128xf32> to vector<14x128xf32>
      %49 = arith.truncf %48 : vector<14x128xf32> to vector<14x128xbf16>
      %c2_28 = arith.constant 2 : index
      %c0_29 = arith.constant 0 : index
      %c0_30 = arith.constant 0 : index
      %50 = vector.load %arg5[%c2_28, %c0_29, %c0_30] : memref<3x128x128xbf16, #tpu.memory_space<vmem>>, vector<1x128x128xbf16>
      %51 = vector.shape_cast %50 : vector<1x128x128xbf16> to vector<128x128xbf16>
      %cst_31 = arith.constant dense<0.000000e+00> : vector<14x128xf32>
      %52 = tpu.matmul %49, %51, %cst_31 {dimension_numbers = #tpu.dot_dimension_numbers<[1], [0], [0], [1], [0, 0, 1, 1], [], []>} : vector<14x128xbf16>, vector<128x128xbf16>, vector<14x128xf32> -> vector<14x128xf32>
      %53 = arith.addf %47, %52 : vector<14x128xf32>
      %c0_32 = arith.constant 0 : index
      %c0_33 = arith.constant 0 : index
      %54 = vector.load %arg6[%c0_32, %c0_33] : memref<1x128xf32, #tpu.memory_space<vmem>>, vector<1x128xf32>
      %55 = vector.broadcast %54 : vector<1x128xf32> to vector<14x128xf32>
      %56 = arith.addf %53, %55 : vector<14x128xf32>
      %cst_34 = arith.constant 0.000000e+00 : f32
      %57 = vector.broadcast %cst_34 : f32 to vector<14x128xf32>
      %58 = arith.maximumf %56, %57 : vector<14x128xf32>
      %59 = vector.extract_strided_slice %58 {offsets = [0, 0], sizes = [12, 128], strides = [1, 1]} : vector<14x128xf32> to vector<12x128xf32>
      %60 = arith.truncf %59 : vector<12x128xf32> to vector<12x128xbf16>
      %c0_35 = arith.constant 0 : index
      %c0_36 = arith.constant 0 : index
      %c0_37 = arith.constant 0 : index
      %61 = vector.load %arg7[%c0_35, %c0_36, %c0_37] : memref<3x128x128xbf16, #tpu.memory_space<vmem>>, vector<1x128x128xbf16>
      %62 = vector.shape_cast %61 : vector<1x128x128xbf16> to vector<128x128xbf16>
      %cst_38 = arith.constant dense<0.000000e+00> : vector<12x128xf32>
      %63 = tpu.matmul %60, %62, %cst_38 {dimension_numbers = #tpu.dot_dimension_numbers<[1], [0], [0], [1], [0, 0, 1, 1], [], []>} : vector<12x128xbf16>, vector<128x128xbf16>, vector<12x128xf32> -> vector<12x128xf32>
      %64 = vector.extract_strided_slice %58 {offsets = [1, 0], sizes = [12, 128], strides = [1, 1]} : vector<14x128xf32> to vector<12x128xf32>
      %65 = arith.truncf %64 : vector<12x128xf32> to vector<12x128xbf16>
      %c1_39 = arith.constant 1 : index
      %c0_40 = arith.constant 0 : index
      %c0_41 = arith.constant 0 : index
      %66 = vector.load %arg7[%c1_39, %c0_40, %c0_41] : memref<3x128x128xbf16, #tpu.memory_space<vmem>>, vector<1x128x128xbf16>
      %67 = vector.shape_cast %66 : vector<1x128x128xbf16> to vector<128x128xbf16>
      %cst_42 = arith.constant dense<0.000000e+00> : vector<12x128xf32>
      %68 = tpu.matmul %65, %67, %cst_42 {dimension_numbers = #tpu.dot_dimension_numbers<[1], [0], [0], [1], [0, 0, 1, 1], [], []>} : vector<12x128xbf16>, vector<128x128xbf16>, vector<12x128xf32> -> vector<12x128xf32>
      %69 = arith.addf %63, %68 : vector<12x128xf32>
      %70 = vector.extract_strided_slice %58 {offsets = [2, 0], sizes = [12, 128], strides = [1, 1]} : vector<14x128xf32> to vector<12x128xf32>
      %71 = arith.truncf %70 : vector<12x128xf32> to vector<12x128xbf16>
      %c2_43 = arith.constant 2 : index
      %c0_44 = arith.constant 0 : index
      %c0_45 = arith.constant 0 : index
      %72 = vector.load %arg7[%c2_43, %c0_44, %c0_45] : memref<3x128x128xbf16, #tpu.memory_space<vmem>>, vector<1x128x128xbf16>
      %73 = vector.shape_cast %72 : vector<1x128x128xbf16> to vector<128x128xbf16>
      %cst_46 = arith.constant dense<0.000000e+00> : vector<12x128xf32>
      %74 = tpu.matmul %71, %73, %cst_46 {dimension_numbers = #tpu.dot_dimension_numbers<[1], [0], [0], [1], [0, 0, 1, 1], [], []>} : vector<12x128xbf16>, vector<128x128xbf16>, vector<12x128xf32> -> vector<12x128xf32>
      %75 = arith.addf %69, %74 : vector<12x128xf32>
      %c0_47 = arith.constant 0 : index
      %c0_48 = arith.constant 0 : index
      %76 = vector.load %arg8[%c0_47, %c0_48] : memref<1x128xf32, #tpu.memory_space<vmem>>, vector<1x128xf32>
      %77 = vector.broadcast %76 : vector<1x128xf32> to vector<12x128xf32>
      %78 = arith.addf %75, %77 : vector<12x128xf32>
      %cst_49 = arith.constant 0.000000e+00 : f32
      %79 = vector.broadcast %cst_49 : f32 to vector<12x128xf32>
      %80 = arith.maximumf %78, %79 : vector<12x128xf32>
      %cst_50 = arith.constant dense<0xFF800000> : vector<128xf32>
      %81 = vector.multi_reduction <maximumf>, %80, %cst_50 [0] : vector<12x128xf32> to vector<128xf32>
      %82 = vector.shape_cast %81 : vector<128xf32> to vector<1x128xf32>
      %83 = vector.extract_strided_slice %12 {offsets = [0, 0], sizes = [14, 128], strides = [1, 1]} : vector<16x128xf32> to vector<14x128xf32>
      %84 = arith.truncf %83 : vector<14x128xf32> to vector<14x128xbf16>
      %c0_51 = arith.constant 0 : index
      %c0_52 = arith.constant 0 : index
      %c0_53 = arith.constant 0 : index
      %85 = vector.load %arg9[%c0_51, %c0_52, %c0_53] : memref<3x128x128xbf16, #tpu.memory_space<vmem>>, vector<1x128x128xbf16>
      %86 = vector.shape_cast %85 : vector<1x128x128xbf16> to vector<128x128xbf16>
      %cst_54 = arith.constant dense<0.000000e+00> : vector<14x128xf32>
      %87 = tpu.matmul %84, %86, %cst_54 {dimension_numbers = #tpu.dot_dimension_numbers<[1], [0], [0], [1], [0, 0, 1, 1], [], []>} : vector<14x128xbf16>, vector<128x128xbf16>, vector<14x128xf32> -> vector<14x128xf32>
      %88 = vector.extract_strided_slice %12 {offsets = [1, 0], sizes = [14, 128], strides = [1, 1]} : vector<16x128xf32> to vector<14x128xf32>
      %89 = arith.truncf %88 : vector<14x128xf32> to vector<14x128xbf16>
      %c1_55 = arith.constant 1 : index
      %c0_56 = arith.constant 0 : index
      %c0_57 = arith.constant 0 : index
      %90 = vector.load %arg9[%c1_55, %c0_56, %c0_57] : memref<3x128x128xbf16, #tpu.memory_space<vmem>>, vector<1x128x128xbf16>
      %91 = vector.shape_cast %90 : vector<1x128x128xbf16> to vector<128x128xbf16>
      %cst_58 = arith.constant dense<0.000000e+00> : vector<14x128xf32>
      %92 = tpu.matmul %89, %91, %cst_58 {dimension_numbers = #tpu.dot_dimension_numbers<[1], [0], [0], [1], [0, 0, 1, 1], [], []>} : vector<14x128xbf16>, vector<128x128xbf16>, vector<14x128xf32> -> vector<14x128xf32>
      %93 = arith.addf %87, %92 : vector<14x128xf32>
      %94 = vector.extract_strided_slice %12 {offsets = [2, 0], sizes = [14, 128], strides = [1, 1]} : vector<16x128xf32> to vector<14x128xf32>
      %95 = arith.truncf %94 : vector<14x128xf32> to vector<14x128xbf16>
      %c2_59 = arith.constant 2 : index
      %c0_60 = arith.constant 0 : index
      %c0_61 = arith.constant 0 : index
      %96 = vector.load %arg9[%c2_59, %c0_60, %c0_61] : memref<3x128x128xbf16, #tpu.memory_space<vmem>>, vector<1x128x128xbf16>
      %97 = vector.shape_cast %96 : vector<1x128x128xbf16> to vector<128x128xbf16>
      %cst_62 = arith.constant dense<0.000000e+00> : vector<14x128xf32>
      %98 = tpu.matmul %95, %97, %cst_62 {dimension_numbers = #tpu.dot_dimension_numbers<[1], [0], [0], [1], [0, 0, 1, 1], [], []>} : vector<14x128xbf16>, vector<128x128xbf16>, vector<14x128xf32> -> vector<14x128xf32>
      %99 = arith.addf %93, %98 : vector<14x128xf32>
      %c0_63 = arith.constant 0 : index
      %c0_64 = arith.constant 0 : index
      %100 = vector.load %arg10[%c0_63, %c0_64] : memref<1x128xf32, #tpu.memory_space<vmem>>, vector<1x128xf32>
      %101 = vector.broadcast %100 : vector<1x128xf32> to vector<14x128xf32>
      %102 = arith.addf %99, %101 : vector<14x128xf32>
      %cst_65 = arith.constant 0.000000e+00 : f32
      %103 = vector.broadcast %cst_65 : f32 to vector<14x128xf32>
      %104 = arith.maximumf %102, %103 : vector<14x128xf32>
      %105 = vector.extract_strided_slice %104 {offsets = [0, 0], sizes = [12, 128], strides = [1, 1]} : vector<14x128xf32> to vector<12x128xf32>
      %106 = arith.truncf %105 : vector<12x128xf32> to vector<12x128xbf16>
      %c0_66 = arith.constant 0 : index
      %c0_67 = arith.constant 0 : index
      %c0_68 = arith.constant 0 : index
      %107 = vector.load %arg11[%c0_66, %c0_67, %c0_68] : memref<3x128x128xbf16, #tpu.memory_space<vmem>>, vector<1x128x128xbf16>
      %108 = vector.shape_cast %107 : vector<1x128x128xbf16> to vector<128x128xbf16>
      %cst_69 = arith.constant dense<0.000000e+00> : vector<12x128xf32>
      %109 = tpu.matmul %106, %108, %cst_69 {dimension_numbers = #tpu.dot_dimension_numbers<[1], [0], [0], [1], [0, 0, 1, 1], [], []>} : vector<12x128xbf16>, vector<128x128xbf16>, vector<12x128xf32> -> vector<12x128xf32>
      %110 = vector.extract_strided_slice %104 {offsets = [1, 0], sizes = [12, 128], strides = [1, 1]} : vector<14x128xf32> to vector<12x128xf32>
      %111 = arith.truncf %110 : vector<12x128xf32> to vector<12x128xbf16>
      %c1_70 = arith.constant 1 : index
      %c0_71 = arith.constant 0 : index
      %c0_72 = arith.constant 0 : index
      %112 = vector.load %arg11[%c1_70, %c0_71, %c0_72] : memref<3x128x128xbf16, #tpu.memory_space<vmem>>, vector<1x128x128xbf16>
      %113 = vector.shape_cast %112 : vector<1x128x128xbf16> to vector<128x128xbf16>
      %cst_73 = arith.constant dense<0.000000e+00> : vector<12x128xf32>
      %114 = tpu.matmul %111, %113, %cst_73 {dimension_numbers = #tpu.dot_dimension_numbers<[1], [0], [0], [1], [0, 0, 1, 1], [], []>} : vector<12x128xbf16>, vector<128x128xbf16>, vector<12x128xf32> -> vector<12x128xf32>
      %115 = arith.addf %109, %114 : vector<12x128xf32>
      %116 = vector.extract_strided_slice %104 {offsets = [2, 0], sizes = [12, 128], strides = [1, 1]} : vector<14x128xf32> to vector<12x128xf32>
      %117 = arith.truncf %116 : vector<12x128xf32> to vector<12x128xbf16>
      %c2_74 = arith.constant 2 : index
      %c0_75 = arith.constant 0 : index
      %c0_76 = arith.constant 0 : index
      %118 = vector.load %arg11[%c2_74, %c0_75, %c0_76] : memref<3x128x128xbf16, #tpu.memory_space<vmem>>, vector<1x128x128xbf16>
      %119 = vector.shape_cast %118 : vector<1x128x128xbf16> to vector<128x128xbf16>
      %cst_77 = arith.constant dense<0.000000e+00> : vector<12x128xf32>
      %120 = tpu.matmul %117, %119, %cst_77 {dimension_numbers = #tpu.dot_dimension_numbers<[1], [0], [0], [1], [0, 0, 1, 1], [], []>} : vector<12x128xbf16>, vector<128x128xbf16>, vector<12x128xf32> -> vector<12x128xf32>
      %121 = arith.addf %115, %120 : vector<12x128xf32>
      %c0_78 = arith.constant 0 : index
      %c0_79 = arith.constant 0 : index
      %122 = vector.load %arg12[%c0_78, %c0_79] : memref<1x128xf32, #tpu.memory_space<vmem>>, vector<1x128xf32>
      %123 = vector.broadcast %122 : vector<1x128xf32> to vector<12x128xf32>
      %124 = arith.addf %121, %123 : vector<12x128xf32>
      %cst_80 = arith.constant 0.000000e+00 : f32
      %125 = vector.broadcast %cst_80 : f32 to vector<12x128xf32>
      %126 = arith.maximumf %124, %125 : vector<12x128xf32>
      %127 = vector.extract_strided_slice %126 {offsets = [0, 0], sizes = [10, 128], strides = [1, 1]} : vector<12x128xf32> to vector<10x128xf32>
      %128 = arith.truncf %127 : vector<10x128xf32> to vector<10x128xbf16>
      %c0_81 = arith.constant 0 : index
      %c0_82 = arith.constant 0 : index
      %c0_83 = arith.constant 0 : index
      %129 = vector.load %arg13[%c0_81, %c0_82, %c0_83] : memref<3x128x128xbf16, #tpu.memory_space<vmem>>, vector<1x128x128xbf16>
      %130 = vector.shape_cast %129 : vector<1x128x128xbf16> to vector<128x128xbf16>
      %cst_84 = arith.constant dense<0.000000e+00> : vector<10x128xf32>
      %131 = tpu.matmul %128, %130, %cst_84 {dimension_numbers = #tpu.dot_dimension_numbers<[1], [0], [0], [1], [0, 0, 1, 1], [], []>} : vector<10x128xbf16>, vector<128x128xbf16>, vector<10x128xf32> -> vector<10x128xf32>
      %132 = vector.extract_strided_slice %126 {offsets = [1, 0], sizes = [10, 128], strides = [1, 1]} : vector<12x128xf32> to vector<10x128xf32>
      %133 = arith.truncf %132 : vector<10x128xf32> to vector<10x128xbf16>
      %c1_85 = arith.constant 1 : index
      %c0_86 = arith.constant 0 : index
      %c0_87 = arith.constant 0 : index
      %134 = vector.load %arg13[%c1_85, %c0_86, %c0_87] : memref<3x128x128xbf16, #tpu.memory_space<vmem>>, vector<1x128x128xbf16>
      %135 = vector.shape_cast %134 : vector<1x128x128xbf16> to vector<128x128xbf16>
      %cst_88 = arith.constant dense<0.000000e+00> : vector<10x128xf32>
      %136 = tpu.matmul %133, %135, %cst_88 {dimension_numbers = #tpu.dot_dimension_numbers<[1], [0], [0], [1], [0, 0, 1, 1], [], []>} : vector<10x128xbf16>, vector<128x128xbf16>, vector<10x128xf32> -> vector<10x128xf32>
      %137 = arith.addf %131, %136 : vector<10x128xf32>
      %138 = vector.extract_strided_slice %126 {offsets = [2, 0], sizes = [10, 128], strides = [1, 1]} : vector<12x128xf32> to vector<10x128xf32>
      %139 = arith.truncf %138 : vector<10x128xf32> to vector<10x128xbf16>
      %c2_89 = arith.constant 2 : index
      %c0_90 = arith.constant 0 : index
      %c0_91 = arith.constant 0 : index
      %140 = vector.load %arg13[%c2_89, %c0_90, %c0_91] : memref<3x128x128xbf16, #tpu.memory_space<vmem>>, vector<1x128x128xbf16>
      %141 = vector.shape_cast %140 : vector<1x128x128xbf16> to vector<128x128xbf16>
      %cst_92 = arith.constant dense<0.000000e+00> : vector<10x128xf32>
      %142 = tpu.matmul %139, %141, %cst_92 {dimension_numbers = #tpu.dot_dimension_numbers<[1], [0], [0], [1], [0, 0, 1, 1], [], []>} : vector<10x128xbf16>, vector<128x128xbf16>, vector<10x128xf32> -> vector<10x128xf32>
      %143 = arith.addf %137, %142 : vector<10x128xf32>
      %c0_93 = arith.constant 0 : index
      %c0_94 = arith.constant 0 : index
      %144 = vector.load %arg14[%c0_93, %c0_94] : memref<1x128xf32, #tpu.memory_space<vmem>>, vector<1x128xf32>
      %145 = vector.broadcast %144 : vector<1x128xf32> to vector<10x128xf32>
      %146 = arith.addf %143, %145 : vector<10x128xf32>
      %cst_95 = arith.constant 0.000000e+00 : f32
      %147 = vector.broadcast %cst_95 : f32 to vector<10x128xf32>
      %148 = arith.maximumf %146, %147 : vector<10x128xf32>
      %cst_96 = arith.constant dense<0xFF800000> : vector<128xf32>
      %149 = vector.multi_reduction <maximumf>, %148, %cst_96 [0] : vector<10x128xf32> to vector<128xf32>
      %150 = vector.shape_cast %149 : vector<128xf32> to vector<1x128xf32>
      %151 = tpu.concatenate %36, %82, %150 in 1 : vector<1x128xf32>, vector<1x128xf32>, vector<1x128xf32> -> vector<1x384xf32>
      %152 = arith.truncf %151 : vector<1x384xf32> to vector<1x384xbf16>
      %c0_97 = arith.constant 0 : index
      %c0_98 = arith.constant 0 : index
      %153 = vector.load %arg15[%c0_97, %c0_98] : memref<384x128xbf16, #tpu.memory_space<vmem>>, vector<384x128xbf16>
      %cst_99 = arith.constant dense<0.000000e+00> : vector<1x128xf32>
      %154 = tpu.matmul %152, %153, %cst_99 {dimension_numbers = #tpu.dot_dimension_numbers<[1], [0], [0], [1], [0, 0, 1, 1], [], []>} : vector<1x384xbf16>, vector<384x128xbf16>, vector<1x128xf32> -> vector<1x128xf32>
      %c0_100 = arith.constant 0 : index
      %c0_101 = arith.constant 0 : index
      %155 = vector.load %arg16[%c0_100, %c0_101] : memref<1x128xf32, #tpu.memory_space<vmem>>, vector<1x128xf32>
      %156 = arith.addf %154, %155 : vector<1x128xf32>
      %157 = arith.index_cast %arg18 : i32 to index
      %c0_102 = arith.constant 0 : index
      %158 = vector.load %arg17[%157, %c0_102] : memref<2x128xf32, #tpu.memory_space<vmem>>, vector<1x128xf32>
      tpu.vector_store %arg17[%157, %c0_102], %156 {strides = array<i32>} : memref<2x128xf32, #tpu.memory_space<vmem>>, vector<1x128xf32>,
    }
    %c2_i32_0 = arith.constant 2 : i32
    return
  }
  func.func @transform_0(%arg0: i32) -> (i32, i32, i32) {
    %c0_i32 = arith.constant 0 : i32
    %c0_i32_0 = arith.constant 0 : i32
    %c0_i32_1 = arith.constant 0 : i32
    return %arg0, %c0_i32, %c0_i32_0 : i32, i32, i32
  }
  func.func @transform_1(%arg0: i32) -> (i32, i32) {
    %c0_i32 = arith.constant 0 : i32
    %c0_i32_0 = arith.constant 0 : i32
    %c0_i32_1 = arith.constant 0 : i32
    return %c0_i32, %c0_i32_0 : i32, i32
  }
  func.func @transform_2(%arg0: i32) -> (i32, i32, i32) {
    %c0_i32 = arith.constant 0 : i32
    %c0_i32_0 = arith.constant 0 : i32
    %c0_i32_1 = arith.constant 0 : i32
    %c0_i32_2 = arith.constant 0 : i32
    return %c0_i32, %c0_i32_0, %c0_i32_1 : i32, i32, i32
  }
  func.func @transform_3(%arg0: i32) -> (i32, i32) {
    %c0_i32 = arith.constant 0 : i32
    %c0_i32_0 = arith.constant 0 : i32
    %c0_i32_1 = arith.constant 0 : i32
    return %c0_i32, %c0_i32_0 : i32, i32
  }
  func.func @transform_4(%arg0: i32) -> (i32, i32, i32) {
    %c0_i32 = arith.constant 0 : i32
    %c0_i32_0 = arith.constant 0 : i32
    %c0_i32_1 = arith.constant 0 : i32
    %c0_i32_2 = arith.constant 0 : i32
    return %c0_i32, %c0_i32_0, %c0_i32_1 : i32, i32, i32
  }
  func.func @transform_5(%arg0: i32) -> (i32, i32) {
    %c0_i32 = arith.constant 0 : i32
    %c0_i32_0 = arith.constant 0 : i32
    %c0_i32_1 = arith.constant 0 : i32
    return %c0_i32, %c0_i32_0 : i32, i32
  }
  func.func @transform_6(%arg0: i32) -> (i32, i32, i32) {
    %c0_i32 = arith.constant 0 : i32
    %c0_i32_0 = arith.constant 0 : i32
    %c0_i32_1 = arith.constant 0 : i32
    %c0_i32_2 = arith.constant 0 : i32
    return %c0_i32, %c0_i32_0, %c0_i32_1 : i32, i32, i32
  }
  func.func @transform_7(%arg0: i32) -> (i32, i32) {
    %c0_i32 = arith.constant 0 : i32
    %c0_i32_0 = arith.constant 0 : i32
    %c0_i32_1 = arith.constant 0 : i32
    return %c0_i32, %c0_i32_0 : i32, i32
  }
  func.func @transform_8(%arg0: i32) -> (i32, i32, i32) {
    %c0_i32 = arith.constant 0 : i32
    %c0_i32_0 = arith.constant 0 : i32
    %c0_i32_1 = arith.constant 0 : i32
    %c0_i32_2 = arith.constant 0 : i32
    return %c0_i32, %c0_i32_0, %c0_i32_1 : i32, i32, i32
  }
  func.func @transform_9(%arg0: i32) -> (i32, i32) {
    %c0_i32 = arith.constant 0 : i32
    %c0_i32_0 = arith.constant 0 : i32
    %c0_i32_1 = arith.constant 0 : i32
    return %c0_i32, %c0_i32_0 : i32, i32
  }
  func.func @transform_10(%arg0: i32) -> (i32, i32, i32) {
    %c0_i32 = arith.constant 0 : i32
    %c0_i32_0 = arith.constant 0 : i32
    %c0_i32_1 = arith.constant 0 : i32
    %c0_i32_2 = arith.constant 0 : i32
    return %c0_i32, %c0_i32_0, %c0_i32_1 : i32, i32, i32
  }
  func.func @transform_11(%arg0: i32) -> (i32, i32) {
    %c0_i32 = arith.constant 0 : i32
    %c0_i32_0 = arith.constant 0 : i32
    %c0_i32_1 = arith.constant 0 : i32
    return %c0_i32, %c0_i32_0 : i32, i32
  }
  func.func @transform_12(%arg0: i32) -> (i32, i32, i32) {
    %c0_i32 = arith.constant 0 : i32
    %c0_i32_0 = arith.constant 0 : i32
    %c0_i32_1 = arith.constant 0 : i32
    %c0_i32_2 = arith.constant 0 : i32
    return %c0_i32, %c0_i32_0, %c0_i32_1 : i32, i32, i32
  }
  func.func @transform_13(%arg0: i32) -> (i32, i32) {
    %c0_i32 = arith.constant 0 : i32
    %c0_i32_0 = arith.constant 0 : i32
    %c0_i32_1 = arith.constant 0 : i32
    return %c0_i32, %c0_i32_0 : i32, i32
  }
  func.func @transform_14(%arg0: i32) -> (i32, i32) {
    %c0_i32 = arith.constant 0 : i32
    %c0_i32_0 = arith.constant 0 : i32
    %c0_i32_1 = arith.constant 0 : i32
    return %c0_i32, %c0_i32_0 : i32, i32
  }
  func.func @transform_15(%arg0: i32) -> (i32, i32) {
    %c0_i32 = arith.constant 0 : i32
    %c0_i32_0 = arith.constant 0 : i32
    %c0_i32_1 = arith.constant 0 : i32
    return %c0_i32, %c0_i32_0 : i32, i32
  }
  func.func @transform_16(%arg0: i32) -> (i32, i32) {
    %c0_i32 = arith.constant 0 : i32
    %c0_i32_0 = arith.constant 0 : i32
    return %arg0, %c0_i32 : i32, i32
  }
}

</mosaic_0001>

<bundles_post_ra>
// kernel: target_representation_forward.1
= control target key start
LH: loop header
LB: loop body
LE: loop exit
PB: predicated region body
PF: predicated region fallthrough
CT: control target
= control target key end

     0   :  { %s4641_s0 = inlined_call_operand.vmem [shape: s32[2,16,1], index: 0, kind: input, shape index: {}]   ;;  %s4642_s1 = inlined_call_operand.vmem [shape: bf16[128,128], index: 1, kind: input, shape index: {}]   ;;  %s4643_s2 = inlined_call_operand.vmem [shape: bf16[3,128,128], index: 2, kind: input, shape index: {}]   ;;  %s4644_s3 = inlined_call_operand.vmem [shape: f32[1,128], index: 3, kind: input, shape index: {}]   ;;  %s4645_s4 = inlined_call_operand.vmem [shape: bf16[3,128,128], index: 4, kind: input, shape index: {}]   ;;  %s4646_s5 = inlined_call_operand.vmem [shape: f32[1,128], index: 5, kind: input, shape index: {}]   ;;  %s4647_s6 = inlined_call_operand.vmem [shape: bf16[3,128,128], index: 6, kind: input, shape index: {}]   ;;  %s4648_s7 = inlined_call_operand.vmem [shape: f32[1,128], index: 7, kind: input, shape index: {}]   ;;  %s4649_s8 = inlined_call_operand.vmem [shape: bf16[3,128,128], index: 8, kind: input, shape index: {}]   ;;  %s4650_s9 = inlined_call_operand.vmem [shape: f32[1,128], index: 9, kind: input, shape index: {}]   ;;  %s4651_s10 = inlined_call_operand.vmem [shape: bf16[3,128,128], index: 10, kind: input, shape index: {}]   ;;  %s4652_s11 = inlined_call_operand.vmem [shape: f32[1,128], index: 11, kind: input, shape index: {}]   ;;  %s4653_s12 = inlined_call_operand.vmem [shape: bf16[3,128,128], index: 12, kind: input, shape index: {}]   ;;  %s4654_s13 = inlined_call_operand.vmem [shape: f32[1,128], index: 13, kind: input, shape index: {}]   ;;  %s4655_s14 = inlined_call_operand.vmem [shape: bf16[384,128], index: 14, kind: input, shape index: {}]   ;;  %s4656_s15 = inlined_call_operand.vmem [shape: f32[1,128], index: 15, kind: input, shape index: {}]   ;;  %s4657_s16 = inlined_call_operand.hbm [shape: f32[2,128], index: 16, kind: output, shape index: {}]  }
   0x1   :  { %4658 = sst [smem:[#allocation5_spill]] %s4641_s0 }
   0x2   :  { %21 = vsyncpa [#allocation3], 0  ;;  %s3829_s21 = smov 0  }
   0x3 LB: > { %v3739_v0 = vmov 0   ;;  %v3740_v1 = vmov 0.0   ;;  %v3531_v2 = vld [vmem:[%s4642_s1] sm:$0xff]   ;;  %s2538_s24 = sshll.u32 %s3737_s21, 4  ;;  %s4659_s27 = sld [smem:[#allocation5_spill]]  ;;  %v3532_v3 = vld [vmem:[%s4642_s1 + $0x8] sm:$0xff]   ;;  %v65_v18 = vlaneseq  ;;  %s3737_s21 = sphi %s3829_s21, %s60_s21  }
   0x4   : > { %3530 = vset.pattern.permute.xlu0 %v3739_v0  ;;  %3117 = vmatprep.subr.bf16.mxu0 %v3740_v1  ;;  %v3533_v6 = vld [vmem:[%s4642_s1 + $0x10] sm:$0xff]   ;;  %vm3741_vm0 = vmmov 0   ;;  %v3534_v7 = vld [vmem:[%s4642_s1 + $0x18] sm:$0xff]   ;;  %v3535_v8 = vld [vmem:[%s4642_s1 + $0x20] sm:$0xff]   ;;  %v3742_v23 = vmov 1.0|1.0  }
   0x5   : > { %3137 = vmatprep.subr.bf16.mxu1 %v3740_v1  ;;  %3118 = vmatpush3.bf16.msra.mxu0 %v3531_v2  ;;  %v3541_v9 = vld [vmem:[%s4643_s2 + $0x40] sm:$0xff]   ;;  %v3536_v10 = vld [vmem:[%s4642_s1 + $0x28] sm:$0xff]   ;;  %v3537_v12 = vld [vmem:[%s4642_s1 + $0x30] sm:$0xff]   ;;  %v66_v20 = vand.u32 127, %v65_v18  ;;  %vm525_vm4 = vcmask 1045504   ;;  %vm1206_vm5 = vcmask 1043456  }
   0x6   : > { %3119 = vmatprep.subr.bf16.mxu0 %v3740_v1  ;;  %3133 = vmatprep.mubr.msk.bf16.mxu0 %vm3741_vm0, %v3740_v1  ;;  %v3543_v11 = vld [vmem:[%s4643_s2 + $0x48] sm:$0xff]   ;;  %v3545_v13 = vld [vmem:[%s4643_s2 + $0x50] sm:$0xff]   ;;  %v3538_v14 = vld [vmem:[%s4642_s1 + $0x38] sm:$0xff]   ;;  %vm2229_vm6 = vcmask 1041408   ;;  %s2514_s29 = scalar_lea.vmem [#allocation2], %s3737_s21  ;;  %s60_s21 = sadd.s32 1, %s3737_s21  }
   0x7   : > { %3153 = vmatprep.mubr.msk.bf16.mxu1 %vm3741_vm0, %v3740_v1  ;;  %3138 = vmatpush3.bf16.msra.mxu1 %v3541_v9  ;;  %v3547_v15 = vld [vmem:[%s4643_s2 + $0x58] sm:$0xff]   ;;  %v3549_v16 = vld [vmem:[%s4643_s2 + $0x60] sm:$0xff]   ;;  %v3551_v17 = vld [vmem:[%s4643_s2 + $0x68] sm:$0xff]   ;;  %p57_p0 = scmp.ge.s32.totalorder %s60_s21, 2  }
   0x8   : > { %3139 = vmatprep.subr.bf16.mxu1 %v3740_v1  ;;  %v3539_v22 = vld [vmem:[%s4643_s2] sm:$0xff]   ;;  %v3540_v24 = vld [vmem:[%s4643_s2 + $0x8] sm:$0xff]   ;;  %v3542_v25 = vld [vmem:[%s4643_s2 + $0x10] sm:$0xff]   ;;  %s3743_s30 = smov (%p57_p0), [#allocation2]  }
   0x9   : > { %s62_s28 = scalar_lea.vmem %s4659_s27, %s2538_s24  ;;  %3120 = vmatpush3.bf16.msra.mxu0 %v3532_v3  ;;  %v3544_v26 = vld [vmem:[%s4643_s2 + $0x18] sm:$0xff]   ;;  %v3546_v27 = vld [vmem:[%s4643_s2 + $0x20] sm:$0xff]   ;;  %v3548_v28 = vld [vmem:[%s4643_s2 + $0x28] sm:$0xff]   ;;  %s2522_s0 = sshll.u32 (%p57_p0), %s3743_s30, 4  ;;  %s2523_s0 = int_to_ptr.vmem [resolvable:$true] %s2522_s0 }
   0xa   : > { %v63_v4 = vld [vmem:[%s62_s28] sm:$0xff]  ;;  %v64_v5 = vld [vmem:[%s62_s28 + $0x8] sm:$0xff]  ;;  %3121 = vmatprep.subr.bf16.mxu0 %v3740_v1  ;;  %v3550_v29 = vld [vmem:[%s4643_s2 + $0x30] sm:$0xff]   ;;  %s3707_s17 = scalar_lea.vmem (%p57_p0), %s2523_s0, 32  ;;  %p3712_p2 = scmp.lt.s32.totalorder (%p57_p0), %s2523_s0, %s2523_s0 }
   0xb   : > { %68 = vperm.xlu0 %3530, %v63_v4   ;;  %3140 = vmatpush3.bf16.msra.mxu1 %v3543_v11  ;;  %v3552_v30 = vld [vmem:[%s4643_s2 + $0x38] sm:$0xff]   ;;  %v3553_v31 = vld [vmem:[%s4643_s2 + $0x70] sm:$0xff]   ;;  %v3554_v36 = vld [vmem:[%s4645_s4 + $0x40] sm:$0xff]   ;;  %p3708_p1 = scmp.ne.s32.totalorder (%p57_p0), %s2523_s0, %s3707_s17  ;;  %p3713_p3 = scmp.lt.s32.totalorder (%p57_p0), %s3707_s17, %s3707_s17 }
   0xc   : > { %3141 = vmatprep.subr.bf16.mxu1 %v3740_v1  ;;  %v3555_v32 = vld [vmem:[%s4643_s2 + $0x78] sm:$0xff]   ;;  %v3556_v40 = vld [vmem:[%s4645_s4 + $0x48] sm:$0xff]   ;;  %v3557_v43 = vld [vmem:[%s4643_s2 + $0x80] sm:$0xff]  }
   0xd   : > { %3122 = vmatpush3.bf16.msra.mxu0 %v3533_v6  ;;  %v3558_v45 = vld [vmem:[%s4645_s4 + $0x50] sm:$0xff]   ;;  %v3559_v46 = vld [vmem:[%s4643_s2 + $0x88] sm:$0xff]   ;;  %v3560_v47 = vld [vmem:[%s4645_s4 + $0x58] sm:$0xff]   ;;  %p3714_p4 = por (%p57_p0), %p3713_p3, %p3712_p2 }
   0xe   : > { %3123 = vmatprep.subr.bf16.mxu0 %v3740_v1  ;;  %v3561_v48 = vld [vmem:[%s4643_s2 + $0x90] sm:$0xff]   ;;  %v3562_v49 = vld [vmem:[%s4645_s4 + $0x60] sm:$0xff]   ;;  %v3563_v50 = vld [vmem:[%s4643_s2 + $0x98] sm:$0xff]  }
   0xf   : > { %71 = vperm.xlu0 %3530, %v64_v5   ;;  %3142 = vmatpush3.bf16.msra.mxu1 %v3545_v13  ;;  %v3564_v51 = vld [vmem:[%s4645_s4 + $0x68] sm:$0xff]   ;;  %v3565_v52 = vld [vmem:[%s4643_s2 + $0xa0] sm:$0xff]   ;;  %v3566_v53 = vld [vmem:[%s4645_s4 + $0x70] sm:$0xff]   ;;  %p3715_p5 = pnand (%p57_p0), %p3714_p4, %p3708_p1 }
  0x10   : > { %3143 = vmatprep.subr.bf16.mxu1 %v3740_v1  ;;  %v3567_v54 = vld [vmem:[%s4643_s2 + $0xa8] sm:$0xff]   ;;  %v3568_v55 = vld [vmem:[%s4645_s4 + $0x78] sm:$0xff]   ;;  %v3569_v56 = vld [vmem:[%s4643_s2 + $0xb0] sm:$0xff]  }
  0x11   : > { %3124 = vmatpush3.bf16.msra.mxu0 %v3534_v7  ;;  %v3570_v57 = vld [vmem:[%s4645_s4 + $0x80] sm:$0xff]   ;;  %v3571_v58 = vld [vmem:[%s4643_s2 + $0xb8] sm:$0xff]   ;;  %v3572_v59 = vld [vmem:[%s4645_s4 + $0x88] sm:$0xff]  }
  0x12   : > { %3125 = vmatprep.subr.bf16.mxu0 %v3740_v1  ;;  %v3573_v60 = vld [vmem:[%s4645_s4] sm:$0xff]   ;;  %v3574_v62 = vld [vmem:[%s4645_s4 + $0x90] sm:$0xff]   ;;  %v3575_v63 = vld [vmem:[%s4645_s4 + $0x8] sm:$0xff]  }
  0x13   : > { %3144 = vmatpush3.bf16.msra.mxu1 %v3547_v15  ;;  %v3576_v0 = vld [vmem:[%s4645_s4 + $0x98] sm:$0xff]   ;;  %v3577_v2 = vld [vmem:[%s4645_s4 + $0x10] sm:$0xff]   ;;  %v3578_v3 = vld [vmem:[%s4645_s4 + $0xa0] sm:$0xff]  }
  0x14   : > { %3145 = vmatprep.subr.bf16.mxu1 %v3740_v1  ;;  %v3579_v4 = vld [vmem:[%s4645_s4 + $0x18] sm:$0xff]   ;;  %v3580_v5 = vld [vmem:[%s4645_s4 + $0xa8] sm:$0xff]   ;;  %v3581_v6 = vld [vmem:[%s4645_s4 + $0x20] sm:$0xff]  }
  0x15   : > { %3126 = vmatpush3.bf16.msra.mxu0 %v3535_v8  ;;  %v3582_v7 = vld [vmem:[%s4645_s4 + $0xb0] sm:$0xff]   ;;  %v3583_v8 = vld [vmem:[%s4645_s4 + $0x28] sm:$0xff]   ;;  %v3584_v9 = vld [vmem:[%s4645_s4 + $0xb8] sm:$0xff]  }
  0x16   : > { %3127 = vmatprep.subr.bf16.mxu0 %v3740_v1  ;;  %v3586_v11 = vld [vmem:[%s4645_s4 + $0x38] sm:$0xff]   ;;  %v3588_v13 = vld [vmem:[%s4647_s6 + $0x8] sm:$0xff]   ;;  %v3590_v15 = vld [vmem:[%s4647_s6 + $0x10] sm:$0xff]  }
  0x17   : > { %3146 = vmatpush3.bf16.msra.mxu1 %v3549_v16  ;;  %v3591_v16 = vld [vmem:[%s4647_s6 + $0x48] sm:$0xff]   ;;  %v3593_v18 = vld [vmem:[%s4647_s6 + $0x50] sm:$0xff]  }
  0x18   : > { %3147 = vmatprep.subr.bf16.mxu1 %v3740_v1 }
  0x19   : > { %3128 = vmatpush3.bf16.msra.mxu0 %v3536_v10  ;;  %v3585_v10 = vld [vmem:[%s4645_s4 + $0x30] sm:$0xff]  }
  0x1a   : > { %3129 = vmatprep.subr.bf16.mxu0 %v3740_v1 }
  0x1b   : > { %3148 = vmatpush3.bf16.msra.mxu1 %v3551_v17  ;;  %v3592_v17 = vld [vmem:[%s4647_s6 + $0x18] sm:$0xff]  }
  0x1c   : > { %3149 = vmatprep.subr.bf16.mxu1 %v3740_v1 }
  0x1d   : > { %3130 = vmatpush3.bf16.msra.mxu0 %v3537_v12  ;;  %v3587_v12 = vld [vmem:[%s4647_s6] sm:$0xff]  }
  0x1e   : > { %3131 = vmatprep.subr.bf16.mxu0 %v3740_v1 }
  0x1f   : > { %3150 = vmatpush3.bf16.msra.mxu1 %v3553_v31 }
  0x20   : > { %3151 = vmatprep.subr.bf16.mxu1 %v3740_v1 }
  0x21   : > { %3132 = vmatpush3.bf16.msra.mxu0 %v3538_v14  ;;  %v3589_v14 = vld [vmem:[%s4647_s6 + $0x40] sm:$0xff]  }
  0x22   : > { %3157 = vmatprep.subr.bf16.mxu0 %v3740_v1 }
  0x23   : > { %3152 = vmatpush3.bf16.msra.mxu1 %v3555_v32 }
  0x24   : > { %3177 = vmatprep.subr.bf16.mxu1 %v3740_v1 }
  0x8a   : > { %v69_v19 = vpop.permute.xlu0 %68 }
  0x8b   : > { %vm73_vm1 = vcmp.eq.s32.totalorder %v69_v19, %v66_v20  ;;  %v3594_v19 = vld [vmem:[%s4647_s6 + $0x20] sm:$0xff]  }
  0x8e   : > { %v72_v21 = vpop.permute.xlu0 %71 }
  0x8f   : > { %vm74_vm2 = vcmp.eq.s32.totalorder %v72_v21, %v66_v20  ;;  %v3595_v20 = vld [vmem:[%s4647_s6 + $0x58] sm:$0xff]   ;;  %v3596_v21 = vld [vmem:[%s4647_s6 + $0x28] sm:$0xff]  }
  0x90   : > { %vm2547_vm3 = vmpackc.low %vm74_vm2, %vm73_vm1 }
  0x91   : > { %3134 = vmatmul.mubr.msk.bf16.vlgmr.msra.gmra.mrb[0].mxu0 %vm2547_vm3, %v3742_v23  ;;  %v3598_v23 = vld [vmem:[%s4647_s6 + $0x30] sm:$0xff]  }
  0x92   : > { %3158 = vmatpush3.bf16.msra.mxu0 %v3539_v22  ;;  %3173 = vmatprep.mubr.msk.bf16.mxu0 %vm3741_vm0, %v3740_v1  ;;  %v3597_v22 = vld [vmem:[%s4647_s6 + $0x60] sm:$0xff]  }
  0x93   : > { %3159 = vmatprep.subr.bf16.mxu0 %v3740_v1 }
  0x96   : > { %3160 = vmatpush3.bf16.msra.mxu0 %v3540_v24  ;;  %v3599_v24 = vld [vmem:[%s4647_s6 + $0x68] sm:$0xff]  }
  0x97   : > { %3161 = vmatprep.subr.bf16.mxu0 %v3740_v1 }
  0x9a   : > { %3162 = vmatpush3.bf16.msra.mxu0 %v3542_v25  ;;  %v3600_v25 = vld [vmem:[%s4647_s6 + $0x38] sm:$0xff]  }
  0x9b   : > { %3163 = vmatprep.subr.bf16.mxu0 %v3740_v1 }
  0x9e   : > { %3164 = vmatpush3.bf16.msra.mxu0 %v3544_v26  ;;  %v3601_v26 = vld [vmem:[%s4647_s6 + $0x70] sm:$0xff]  }
  0x9f   : > { %3165 = vmatprep.subr.bf16.mxu0 %v3740_v1 }
  0xa2   : > { %3166 = vmatpush3.bf16.msra.mxu0 %v3546_v27  ;;  %v3603_v27 = vld [vmem:[%s4647_s6 + $0x78] sm:$0xff]  }
  0xa3   : > { %3167 = vmatprep.subr.bf16.mxu0 %v3740_v1 }
  0xa6   : > { %3168 = vmatpush3.bf16.msra.mxu0 %v3548_v28 }
  0xa7   : > { %3169 = vmatprep.subr.bf16.mxu0 %v3740_v1 }
  0xaa   : > { %3170 = vmatpush3.bf16.msra.mxu0 %v3550_v29 }
  0xab   : > { %3171 = vmatprep.subr.bf16.mxu0 %v3740_v1 }
  0xae   : > { %3172 = vmatpush3.bf16.msra.mxu0 %v3552_v30 }
  0xaf   : > { %3197 = vmatprep.subr.bf16.mxu0 %v3740_v1 }
 0x164   : > { %v176_v33 = vpop.f32.mrb[0].mxu0 }
 0x165   : > { %v3135_v34 = vpop.f32.mrb[1].mxu0 }
 0x166   : > { %v179_v35 = vpop.f32.mrb[2].mxu0 }
 0x167   : > { %v3945_v37 = vpack.c.bf16 %v179_v35, %v176_v33  ;;  %v3136_v38 = vpop.f32.mrb[3].mxu0 }
 0x169   : > { %3174 = vmatmul.mubr.bf16.vlgmr.msra.gmra.mrb[4].mxu0 %v3945_v37  ;;  %v220_v39 = vshll.u32 %v3945_v37, 16  ;;  %v218_v41 = vshrl.u32 %v3945_v37, 16  ;;  %v4031_v61 = vrot.slane %v3945_v37, 1 }
 0x16a   : > { %3198 = vmatpush3.bf16.msra.mxu0 %v3554_v36  ;;  %3213 = vmatprep.mubr.msk.bf16.mxu0 %vm3741_vm0, %v3740_v1 }
 0x16b   : > { %3199 = vmatprep.subr.bf16.mxu0 %v3740_v1  ;;  %v222_v42 = vrot.slane %v220_v39, 1 }
 0x16d   : > { %v3959_v44 = vor.u32 %v222_v42, %v218_v41 }
 0x16e   : > { %3200 = vmatpush3.bf16.msra.mxu0 %v3556_v40 }
 0x16f   : > { %3154 = vmatmul.mubr.bf16.vlgmr.msra.gmra.mrb[0].mxu1 %v3959_v44  ;;  %3201 = vmatprep.subr.bf16.mxu0 %v3740_v1 }
 0x170   : > { %3178 = vmatpush3.bf16.msra.mxu1 %v3557_v43  ;;  %3193 = vmatprep.mubr.msk.bf16.mxu1 %vm3741_vm0, %v3740_v1 }
 0x171   : > { %3179 = vmatprep.subr.bf16.mxu1 %v3740_v1 }
 0x172   : > { %3202 = vmatpush3.bf16.msra.mxu0 %v3558_v45 }
 0x173   : > { %3203 = vmatprep.subr.bf16.mxu0 %v3740_v1 }
 0x174   : > { %3180 = vmatpush3.bf16.msra.mxu1 %v3559_v46  ;;  %v2605_v46 = vld [vmem:[%s4644_s3] ss:$0 sm:$0xff] }
 0x175   : > { %3181 = vmatprep.subr.bf16.mxu1 %v3740_v1 }
 0x176   : > { %3204 = vmatpush3.bf16.msra.mxu0 %v3560_v47 }
 0x177   : > { %3205 = vmatprep.subr.bf16.mxu0 %v3740_v1 }
 0x178   : > { %3182 = vmatpush3.bf16.msra.mxu1 %v3561_v48 }
 0x179   : > { %3183 = vmatprep.subr.bf16.mxu1 %v3740_v1 }
 0x17a   : > { %3206 = vmatpush3.bf16.msra.mxu0 %v3562_v49 }
 0x17b   : > { %3207 = vmatprep.subr.bf16.mxu0 %v3740_v1 }
 0x17c   : > { %3184 = vmatpush3.bf16.msra.mxu1 %v3563_v50 }
 0x17d   : > { %3185 = vmatprep.subr.bf16.mxu1 %v3740_v1 }
 0x17e   : > { %3208 = vmatpush3.bf16.msra.mxu0 %v3564_v51 }
 0x17f   : > { %3209 = vmatprep.subr.bf16.mxu0 %v3740_v1 }
 0x180   : > { %3186 = vmatpush3.bf16.msra.mxu1 %v3565_v52 }
 0x181   : > { %3187 = vmatprep.subr.bf16.mxu1 %v3740_v1 }
 0x182   : > { %3210 = vmatpush3.bf16.msra.mxu0 %v3566_v53 }
 0x183   : > { %3211 = vmatprep.subr.bf16.mxu0 %v3740_v1 }
 0x184   : > { %3188 = vmatpush3.bf16.msra.mxu1 %v3567_v54 }
 0x185   : > { %3189 = vmatprep.subr.bf16.mxu1 %v3740_v1 }
 0x186   : > { %3212 = vmatpush3.bf16.msra.mxu0 %v3568_v55 }
 0x187   : > { %3237 = vmatprep.subr.bf16.mxu0 %v3740_v1 }
 0x188   : > { %3190 = vmatpush3.bf16.msra.mxu1 %v3569_v56 }
 0x189   : > { %3214 = vmatmul.mubr.bf16.vlgmr.msra.gmra.mrb[8].mxu0 %v3959_v44  ;;  %3191 = vmatprep.subr.bf16.mxu1 %v3740_v1 }
 0x18a   : > { %3238 = vmatpush3.bf16.msra.mxu0 %v3570_v57  ;;  %3253 = vmatprep.mubr.msk.bf16.mxu0 %vm3741_vm0, %v3740_v1 }
 0x18b   : > { %3239 = vmatprep.subr.bf16.mxu0 %v3740_v1 }
 0x18c   : > { %3192 = vmatpush3.bf16.msra.mxu1 %v3571_v58 }
 0x18d   : > { %3217 = vmatprep.subr.bf16.mxu1 %v3740_v1 }
 0x18e   : > { %3240 = vmatpush3.bf16.msra.mxu0 %v3572_v59 }
 0x18f   : > { %3194 = vmatmul.mubr.bf16.vlgmr.msra.gmra.mrb[4].mxu1 %v4031_v61  ;;  %3241 = vmatprep.subr.bf16.mxu0 %v3740_v1 }
 0x190   : > { %3218 = vmatpush3.bf16.msra.mxu1 %v3573_v60  ;;  %3233 = vmatprep.mubr.msk.bf16.mxu1 %vm3741_vm0, %v3740_v1 }
 0x191   : > { %3219 = vmatprep.subr.bf16.mxu1 %v3740_v1 }
 0x192   : > { %3242 = vmatpush3.bf16.msra.mxu0 %v3574_v62 }
 0x193   : > { %3243 = vmatprep.subr.bf16.mxu0 %v3740_v1 }
 0x194   : > { %3220 = vmatpush3.bf16.msra.mxu1 %v3575_v63 }
 0x195   : > { %3221 = vmatprep.subr.bf16.mxu1 %v3740_v1 }
 0x196   : > { %3244 = vmatpush3.bf16.msra.mxu0 %v3576_v0 }
 0x197   : > { %3245 = vmatprep.subr.bf16.mxu0 %v3740_v1 }
 0x198   : > { %3222 = vmatpush3.bf16.msra.mxu1 %v3577_v2  ;;  %v2662_v2 = vld [vmem:[%s4646_s5] ss:$0 sm:$0xff] }
 0x199   : > { %3223 = vmatprep.subr.bf16.mxu1 %v3740_v1 }
 0x19a   : > { %3246 = vmatpush3.bf16.msra.mxu0 %v3578_v3 }
 0x19b   : > { %3247 = vmatprep.subr.bf16.mxu0 %v3740_v1 }
 0x19c   : > { %3224 = vmatpush3.bf16.msra.mxu1 %v3579_v4 }
 0x19d   : > { %3225 = vmatprep.subr.bf16.mxu1 %v3740_v1 }
 0x19e   : > { %3248 = vmatpush3.bf16.msra.mxu0 %v3580_v5 }
 0x19f   : > { %3249 = vmatprep.subr.bf16.mxu0 %v3740_v1 }
 0x1a0   : > { %3226 = vmatpush3.bf16.msra.mxu1 %v3581_v6 }
 0x1a1   : > { %3227 = vmatprep.subr.bf16.mxu1 %v3740_v1 }
 0x1a2   : > { %3250 = vmatpush3.bf16.msra.mxu0 %v3582_v7 }
 0x1a3   : > { %3251 = vmatprep.subr.bf16.mxu0 %v3740_v1 }
 0x1a4   : > { %3228 = vmatpush3.bf16.msra.mxu1 %v3583_v8 }
 0x1a5   : > { %3229 = vmatprep.subr.bf16.mxu1 %v3740_v1 }
 0x1a6   : > { %3252 = vmatpush3.bf16.msra.mxu0 %v3584_v9 }
 0x1a7   : > { %3277 = vmatprep.subr.bf16.mxu0 %v3740_v1 }
 0x1a8   : > { %3230 = vmatpush3.bf16.msra.mxu1 %v3585_v10 }
 0x1a9   : > { %3254 = vmatmul.mubr.bf16.vlgmr.msra.gmra.mrb[12].mxu0 %v4031_v61  ;;  %3231 = vmatprep.subr.bf16.mxu1 %v3740_v1 }
 0x1aa   : > { %3293 = vmatprep.mubr.msk.bf16.mxu0 %vm3741_vm0, %v3740_v1  ;;  %3278 = vmatpush3.bf16.msra.mxu0 %v3587_v12  ;;  %v3602_v12 = vld [vmem:[%s4649_s8 + $0x40] sm:$0xff]  }
 0x1ab   : > { %3279 = vmatprep.subr.bf16.mxu0 %v3740_v1 }
 0x1ac   : > { %3232 = vmatpush3.bf16.msra.mxu1 %v3586_v11 }
 0x1ad   : > { %3257 = vmatprep.subr.bf16.mxu1 %v3740_v1 }
 0x1ae   : > { %3280 = vmatpush3.bf16.msra.mxu0 %v3588_v13 }
 0x1af   : > { %3234 = vmatmul.mubr.bf16.vlgmr.msra.gmra.mrb[8].mxu1 %v3945_v37  ;;  %3281 = vmatprep.subr.bf16.mxu0 %v3740_v1 }
 0x1b0   : > { %3273 = vmatprep.mubr.msk.bf16.mxu1 %vm3741_vm0, %v3740_v1  ;;  %3258 = vmatpush3.bf16.msra.mxu1 %v3589_v14 }
 0x1b1   : > { %3259 = vmatprep.subr.bf16.mxu1 %v3740_v1 }
 0x1b2   : > { %3282 = vmatpush3.bf16.msra.mxu0 %v3590_v15  ;;  %v3604_v15 = vld [vmem:[%s4649_s8 + $0x48] sm:$0xff]  }
 0x1b3   : > { %3283 = vmatprep.subr.bf16.mxu0 %v3740_v1 }
 0x1b4   : > { %3260 = vmatpush3.bf16.msra.mxu1 %v3591_v16 }
 0x1b5   : > { %3261 = vmatprep.subr.bf16.mxu1 %v3740_v1 }
 0x1b6   : > { %3284 = vmatpush3.bf16.msra.mxu0 %v3592_v17 }
 0x1b7   : > { %3285 = vmatprep.subr.bf16.mxu0 %v3740_v1 }
 0x1b8   : > { %3262 = vmatpush3.bf16.msra.mxu1 %v3593_v18  ;;  %v3605_v18 = vld [vmem:[%s4647_s6 + $0x80] sm:$0xff]  }
 0x1b9   : > { %3263 = vmatprep.subr.bf16.mxu1 %v3740_v1 }
 0x1ba   : > { %3286 = vmatpush3.bf16.msra.mxu0 %v3594_v19 }
 0x1bb   : > { %3287 = vmatprep.subr.bf16.mxu0 %v3740_v1 }
 0x1bc   : > { %3264 = vmatpush3.bf16.msra.mxu1 %v3595_v20  ;;  %v3606_v20 = vld [vmem:[%s4649_s8 + $0x50] sm:$0xff]  }
 0x1bd   : > { %3265 = vmatprep.subr.bf16.mxu1 %v3740_v1 }
 0x1be   : > { %3288 = vmatpush3.bf16.msra.mxu0 %v3596_v21  ;;  %v3607_v21 = vld [vmem:[%s4647_s6 + $0x88] sm:$0xff]  }
 0x1bf   : > { %3289 = vmatprep.subr.bf16.mxu0 %v3740_v1 }
 0x1c0   : > { %3266 = vmatpush3.bf16.msra.mxu1 %v3597_v22  ;;  %v3608_v22 = vld [vmem:[%s4649_s8 + $0x58] sm:$0xff]  }
 0x1c1   : > { %3267 = vmatprep.subr.bf16.mxu1 %v3740_v1 }
 0x1c2   : > { %3290 = vmatpush3.bf16.msra.mxu0 %v3598_v23  ;;  %v3609_v23 = vld [vmem:[%s4647_s6 + $0x90] sm:$0xff]  }
 0x1c3   : > { %3291 = vmatprep.subr.bf16.mxu0 %v3740_v1 }
 0x1c4   : > { %3268 = vmatpush3.bf16.msra.mxu1 %v3599_v24  ;;  %v3610_v24 = vld [vmem:[%s4649_s8 + $0x60] sm:$0xff]  }
 0x1c5   : > { %3269 = vmatprep.subr.bf16.mxu1 %v3740_v1 }
 0x1c6   : > { %3292 = vmatpush3.bf16.msra.mxu0 %v3600_v25  ;;  %v3611_v25 = vld [vmem:[%s4647_s6 + $0x98] sm:$0xff]  }
 0x1c7   : > { %3317 = vmatprep.subr.bf16.mxu0 %v3740_v1 }
 0x1c8   : > { %3270 = vmatpush3.bf16.msra.mxu1 %v3601_v26  ;;  %v3612_v26 = vld [vmem:[%s4649_s8 + $0x68] sm:$0xff]  }
 0x1c9   : > { %3271 = vmatprep.subr.bf16.mxu1 %v3740_v1 }
 0x1cc   : > { %3272 = vmatpush3.bf16.msra.mxu1 %v3603_v27  ;;  %v3613_v27 = vld [vmem:[%s4647_s6 + $0xa0] sm:$0xff]  }
 0x1cd   : > { %3297 = vmatprep.subr.bf16.mxu1 %v3740_v1 }
 0x23c   : > { %v396_v28 = vpop.f32.mrb[4].mxu0 }
 0x23d   : > { %v3175_v29 = vpop.f32.mrb[5].mxu0 }
 0x23e   : > { %v399_v30 = vpop.f32.mrb[6].mxu0  ;;  %v3615_v29 = vld [vmem:[%s4647_s6 + $0xa8] sm:$0xff]  }
 0x23f   : > { %v3176_v31 = vpop.f32.mrb[7].mxu0 }
 0x240   : > { %v3617_v31 = vld [vmem:[%s4647_s6 + $0xb0] sm:$0xff]  }
 0x242   : > { %v307_v32 = vpop.f32.mrb[0].mxu1 }
 0x243   : > { %v397_v33 = vadd.f32 %v396_v28, %v307_v32  ;;  %v3155_v34 = vpop.f32.mrb[1].mxu1  ;;  %v3614_v28 = vld [vmem:[%s4649_s8 + $0x70] sm:$0xff]   ;;  %v3618_v32 = vld [vmem:[%s4649_s8 + $0x80] sm:$0xff]  }
 0x244   : > { %v310_v35 = vpop.f32.mrb[2].mxu1  ;;  %v3620_v34 = vld [vmem:[%s4649_s8 + $0x88] sm:$0xff]  }
 0x245   : > { %v400_v36 = vadd.f32 %v399_v30, %v310_v35  ;;  %v3156_v38 = vpop.f32.mrb[3].mxu1  ;;  %v3616_v30 = vld [vmem:[%s4649_s8 + $0x78] sm:$0xff]   ;;  %v3621_v35 = vld [vmem:[%s4649_s8] sm:$0xff]  }
 0x246   : > { %v3623_v38 = vld [vmem:[%s4649_s8 + $0x8] sm:$0xff]  }
 0x25c   : > { %v649_v39 = vpop.f32.mrb[8].mxu0 }
 0x25d   : > { %v3215_v40 = vpop.f32.mrb[9].mxu0 }
 0x25e   : > { %v652_v41 = vpop.f32.mrb[10].mxu0  ;;  %v3625_v40 = vld [vmem:[%s4649_s8 + $0x10] sm:$0xff]  }
 0x25f   : > { %v3216_v42 = vpop.f32.mrb[11].mxu0 }
 0x260   : > { %v3627_v42 = vld [vmem:[%s4649_s8 + $0x18] sm:$0xff]  }
 0x262   : > { %v505_v43 = vpop.f32.mrb[4].mxu1 }
 0x263   : > { %v512_v45 = vadd.f32 %v505_v43, %v397_v33  ;;  %v3195_v47 = vpop.f32.mrb[5].mxu1  ;;  %v3619_v33 = vld [vmem:[%s4647_s6 + $0xb8] sm:$0xff]   ;;  %v3628_v43 = vld [vmem:[%s4649_s8 + $0xa8] sm:$0xff]  }
 0x264   : > { %v508_v48 = vpop.f32.mrb[6].mxu1  ;;  %v3631_v47 = vld [vmem:[%s4649_s8 + $0x28] sm:$0xff]  }
 0x265   : > { %v513_v49 = vadd.f32 %v508_v48, %v400_v36  ;;  %v3196_v50 = vpop.f32.mrb[7].mxu1  ;;  %v521_v51 = vadd.f32 %v2605_v46, %v512_v45  ;;  %v3629_v45 = vld [vmem:[%s4649_s8 + $0x20] sm:$0xff]   ;;  %v3632_v48 = vld [vmem:[%s4649_s8 + $0xb8] sm:$0xff]  }
 0x266   : > { %v3634_v50 = vld [vmem:[%s4649_s8 + $0x38] sm:$0xff]  }
 0x267   : > { %v522_v52 = vadd.f32 %v2605_v46, %v513_v49  ;;  %v523_v54 = vmax.f32 %v521_v51, 0.0  ;;  %v3630_v46 = vld [vmem:[%s4649_s8 + $0xb0] sm:$0xff]   ;;  %v3635_v51 = vld [vmem:[%s4651_s10] sm:$0xff]  }
 0x268   : > { %v3633_v49 = vld [vmem:[%s4649_s8 + $0x30] sm:$0xff]  }
 0x269   : > { %v524_v53 = vmax.f32 %v522_v52, 0.0  ;;  %v3637_v52 = vld [vmem:[%s4651_s10 + $0x40] sm:$0xff]  }
 0x26b   : > { %v526_v55 = vsel %vm525_vm4, %v524_v53, -inf  ;;  %v3638_v53 = vld [vmem:[%s4651_s10 + $0x10] sm:$0xff]  }
 0x26c   : > { %v4164_v56 = vmax.f32 %v523_v54, %v526_v55  ;;  %v3640_v54 = vld [vmem:[%s4651_s10 + $0x18] sm:$0xff]   ;;  %v3641_v55 = vld [vmem:[%s4651_s10 + $0x50] sm:$0xff]  }
 0x27c   : > { %v844_v57 = vpop.f32.mrb[12].mxu0 }
 0x27d   : > { %v3255_v58 = vpop.f32.mrb[13].mxu0 }
 0x27e   : > { %v847_v59 = vpop.f32.mrb[14].mxu0  ;;  %v3643_v58 = vld [vmem:[%s4651_s10 + $0x58] sm:$0xff]  }
 0x27f   : > { %v3256_v60 = vpop.f32.mrb[15].mxu0 }
 0x280   : > { %v3645_v60 = vld [vmem:[%s4651_s10 + $0x60] sm:$0xff]  }
 0x282   : > { %v738_v62 = vpop.f32.mrb[8].mxu1 }
 0x283   : > { %v739_v63 = vadd.f32 %v738_v62, %v649_v39  ;;  %v3235_v0 = vpop.f32.mrb[9].mxu1  ;;  %v3624_v39 = vld [vmem:[%s4649_s8 + $0x98] sm:$0xff]   ;;  %v3646_v62 = vld [vmem:[%s4651_s10 + $0x30] sm:$0xff]  }
 0x284   : > { %v741_v3 = vpop.f32.mrb[10].mxu1  ;;  %v3648_v0 = vld [vmem:[%s4651_s10 + $0x38] sm:$0xff]  }
 0x285   : > { %v851_v4 = vadd.f32 %v844_v57, %v739_v63  ;;  %v742_v5 = vadd.f32 %v741_v3, %v652_v41  ;;  %v3236_v6 = vpop.f32.mrb[11].mxu1  ;;  %v3626_v41 = vld [vmem:[%s4649_s8 + $0xa0] sm:$0xff]   ;;  %v3647_v63 = vld [vmem:[%s4651_s10 + $0x68] sm:$0xff]   ;;  %v3650_v3 = vld [vmem:[%s4651_s10 + $0x78] sm:$0xff]  }
 0x286   : > { %v3642_v57 = vld [vmem:[%s4651_s10 + $0x20] sm:$0xff]  }
 0x287   : > { %v860_v7 = vadd.f32 %v2662_v2, %v851_v4  ;;  %v852_v8 = vadd.f32 %v847_v59, %v742_v5  ;;  %v3644_v59 = vld [vmem:[%s4651_s10 + $0x28] sm:$0xff]  }
 0x289   : > { %v861_v9 = vadd.f32 %v2662_v2, %v852_v8  ;;  %v862_v10 = vmax.f32 %v860_v7, 0.0  ;;  %v3649_v2 = vld [vmem:[%s4651_s10 + $0x70] sm:$0xff]  }
 0x28b   : > { %v863_v11 = vmax.f32 %v861_v9, 0.0 }
 0x28d   : > { %v4172_v13 = vpack.c.bf16 %v863_v11, %v862_v10 }
 0x28f   : > { %3294 = vmatmul.mubr.bf16.vlgmr.msra.gmra.mrb[16].mxu0 %v4172_v13  ;;  %v901_v14 = vshll.u32 %v4172_v13, 16  ;;  %v899_v16 = vshrl.u32 %v4172_v13, 16  ;;  %v1102_v36 = vrot.slane %v4172_v13, 1 }
 0x290   : > { %3318 = vmatpush3.bf16.msra.mxu0 %v3602_v12  ;;  %3333 = vmatprep.mubr.msk.bf16.mxu0 %vm3741_vm0, %v3740_v1 }
 0x291   : > { %3319 = vmatprep.subr.bf16.mxu0 %v3740_v1  ;;  %v903_v17 = vrot.slane %v901_v14, 1 }
 0x293   : > { %v904_v19 = vor.u32 %v903_v17, %v899_v16 }
 0x294   : > { %3320 = vmatpush3.bf16.msra.mxu0 %v3604_v15 }
 0x295   : > { %3274 = vmatmul.mubr.bf16.vlgmr.msra.gmra.mrb[12].mxu1 %v904_v19  ;;  %3321 = vmatprep.subr.bf16.mxu0 %v3740_v1 }
 0x296   : > { %3298 = vmatpush3.bf16.msra.mxu1 %v3605_v18  ;;  %3313 = vmatprep.mubr.msk.bf16.mxu1 %vm3741_vm0, %v3740_v1 }
 0x297   : > { %3299 = vmatprep.subr.bf16.mxu1 %v3740_v1 }
 0x298   : > { %3322 = vmatpush3.bf16.msra.mxu0 %v3606_v20  ;;  %v2719_v20 = vld [vmem:[%s4648_s7] ss:$0 sm:$0xff] }
 0x299   : > { %3323 = vmatprep.subr.bf16.mxu0 %v3740_v1 }
 0x29a   : > { %3300 = vmatpush3.bf16.msra.mxu1 %v3607_v21 }
 0x29b   : > { %3301 = vmatprep.subr.bf16.mxu1 %v3740_v1 }
 0x29c   : > { %3324 = vmatpush3.bf16.msra.mxu0 %v3608_v22 }
 0x29d   : > { %3325 = vmatprep.subr.bf16.mxu0 %v3740_v1 }
 0x29e   : > { %3302 = vmatpush3.bf16.msra.mxu1 %v3609_v23 }
 0x29f   : > { %3303 = vmatprep.subr.bf16.mxu1 %v3740_v1 }
 0x2a0   : > { %3326 = vmatpush3.bf16.msra.mxu0 %v3610_v24 }
 0x2a1   : > { %3327 = vmatprep.subr.bf16.mxu0 %v3740_v1 }
 0x2a2   : > { %3304 = vmatpush3.bf16.msra.mxu1 %v3611_v25 }
 0x2a3   : > { %3305 = vmatprep.subr.bf16.mxu1 %v3740_v1 }
 0x2a4   : > { %3328 = vmatpush3.bf16.msra.mxu0 %v3612_v26 }
 0x2a5   : > { %3329 = vmatprep.subr.bf16.mxu0 %v3740_v1 }
 0x2a6   : > { %3306 = vmatpush3.bf16.msra.mxu1 %v3613_v27 }
 0x2a7   : > { %3307 = vmatprep.subr.bf16.mxu1 %v3740_v1 }
 0x2a8   : > { %3330 = vmatpush3.bf16.msra.mxu0 %v3614_v28 }
 0x2a9   : > { %3331 = vmatprep.subr.bf16.mxu0 %v3740_v1 }
 0x2aa   : > { %3308 = vmatpush3.bf16.msra.mxu1 %v3615_v29 }
 0x2ab   : > { %3309 = vmatprep.subr.bf16.mxu1 %v3740_v1 }
 0x2ac   : > { %3332 = vmatpush3.bf16.msra.mxu0 %v3616_v30 }
 0x2ad   : > { %3357 = vmatprep.subr.bf16.mxu0 %v3740_v1 }
 0x2ae   : > { %3310 = vmatpush3.bf16.msra.mxu1 %v3617_v31 }
 0x2af   : > { %3334 = vmatmul.mubr.bf16.vlgmr.msra.gmra.mrb[20].mxu0 %v3959_v44  ;;  %3311 = vmatprep.subr.bf16.mxu1 %v3740_v1  ;;  %v3622_v44 = vld [vmem:[%s4649_s8 + $0x90] sm:$0xff]  }
 0x2b0   : > { %3358 = vmatpush3.bf16.msra.mxu0 %v3618_v32  ;;  %3373 = vmatprep.mubr.msk.bf16.mxu0 %vm3741_vm0, %v3740_v1 }
 0x2b1   : > { %3359 = vmatprep.subr.bf16.mxu0 %v3740_v1 }
 0x2b2   : > { %3312 = vmatpush3.bf16.msra.mxu1 %v3619_v33 }
 0x2b3   : > { %3337 = vmatprep.subr.bf16.mxu1 %v3740_v1 }
 0x2b4   : > { %3360 = vmatpush3.bf16.msra.mxu0 %v3620_v34 }
 0x2b5   : > { %3314 = vmatmul.mubr.bf16.vlgmr.msra.gmra.mrb[16].mxu1 %v1102_v36  ;;  %3361 = vmatprep.subr.bf16.mxu0 %v3740_v1 }
 0x2b6   : > { %3338 = vmatpush3.bf16.msra.mxu1 %v3621_v35  ;;  %3353 = vmatprep.mubr.msk.bf16.mxu1 %vm3741_vm0, %v3740_v1 }
 0x2b7   : > { %3339 = vmatprep.subr.bf16.mxu1 %v3740_v1 }
 0x2b8   : > { %3362 = vmatpush3.bf16.msra.mxu0 %v3622_v44 }
 0x2b9   : > { %3363 = vmatprep.subr.bf16.mxu0 %v3740_v1 }
 0x2ba   : > { %3340 = vmatpush3.bf16.msra.mxu1 %v3623_v38  ;;  %v2776_v38 = vld [vmem:[%s4650_s9] ss:$0 sm:$0xff] }
 0x2bb   : > { %3341 = vmatprep.subr.bf16.mxu1 %v3740_v1 }
 0x2bc   : > { %3364 = vmatpush3.bf16.msra.mxu0 %v3624_v39 }
 0x2bd   : > { %3365 = vmatprep.subr.bf16.mxu0 %v3740_v1 }
 0x2be   : > { %3342 = vmatpush3.bf16.msra.mxu1 %v3625_v40 }
 0x2bf   : > { %3343 = vmatprep.subr.bf16.mxu1 %v3740_v1 }
 0x2c0   : > { %3366 = vmatpush3.bf16.msra.mxu0 %v3626_v41 }
 0x2c1   : > { %3367 = vmatprep.subr.bf16.mxu0 %v3740_v1 }
 0x2c2   : > { %3344 = vmatpush3.bf16.msra.mxu1 %v3627_v42 }
 0x2c3   : > { %3345 = vmatprep.subr.bf16.mxu1 %v3740_v1 }
 0x2c4   : > { %3368 = vmatpush3.bf16.msra.mxu0 %v3628_v43 }
 0x2c5   : > { %3369 = vmatprep.subr.bf16.mxu0 %v3740_v1 }
 0x2c6   : > { %3346 = vmatpush3.bf16.msra.mxu1 %v3629_v45 }
 0x2c7   : > { %3347 = vmatprep.subr.bf16.mxu1 %v3740_v1 }
 0x2c8   : > { %3370 = vmatpush3.bf16.msra.mxu0 %v3630_v46 }
 0x2c9   : > { %3371 = vmatprep.subr.bf16.mxu0 %v3740_v1 }
 0x2ca   : > { %3348 = vmatpush3.bf16.msra.mxu1 %v3631_v47 }
 0x2cb   : > { %3349 = vmatprep.subr.bf16.mxu1 %v3740_v1 }
 0x2cc   : > { %3372 = vmatpush3.bf16.msra.mxu0 %v3632_v48 }
 0x2cd   : > { %3397 = vmatprep.subr.bf16.mxu0 %v3740_v1 }
 0x2ce   : > { %3350 = vmatpush3.bf16.msra.mxu1 %v3633_v49 }
 0x2cf   : > { %3374 = vmatmul.mubr.bf16.vlgmr.msra.gmra.mrb[24].mxu0 %v4031_v61  ;;  %3351 = vmatprep.subr.bf16.mxu1 %v3740_v1  ;;  %v3636_v61 = vld [vmem:[%s4651_s10 + $0x8] sm:$0xff]  }
 0x2d0   : > { %3413 = vmatprep.mubr.msk.bf16.mxu0 %vm3741_vm0, %v3740_v1  ;;  %3398 = vmatpush3.bf16.msra.mxu0 %v3635_v51 }
 0x2d1   : > { %3399 = vmatprep.subr.bf16.mxu0 %v3740_v1 }
 0x2d2   : > { %3352 = vmatpush3.bf16.msra.mxu1 %v3634_v50 }
 0x2d3   : > { %3377 = vmatprep.subr.bf16.mxu1 %v3740_v1 }
 0x2d4   : > { %3400 = vmatpush3.bf16.msra.mxu0 %v3636_v61 }
 0x2d5   : > { %3354 = vmatmul.mubr.bf16.vlgmr.msra.gmra.mrb[20].mxu1 %v3945_v37  ;;  %v3639_v37 = vld [vmem:[%s4651_s10 + $0x48] sm:$0xff]   ;;  %3401 = vmatprep.subr.bf16.mxu0 %v3740_v1 }
 0x2d6   : > { %3393 = vmatprep.mubr.msk.bf16.mxu1 %vm3741_vm0, %v3740_v1  ;;  %3378 = vmatpush3.bf16.msra.mxu1 %v3637_v52  ;;  %v3651_v52 = vld [vmem:[%s4651_s10 + $0x80] sm:$0xff]  }
 0x2d7   : > { %3379 = vmatprep.subr.bf16.mxu1 %v3740_v1 }
 0x2d8   : > { %3402 = vmatpush3.bf16.msra.mxu0 %v3638_v53  ;;  %v3652_v53 = vld [vmem:[%s4651_s10 + $0x88] sm:$0xff]  }
 0x2d9   : > { %3403 = vmatprep.subr.bf16.mxu0 %v3740_v1 }
 0x2da   : > { %3380 = vmatpush3.bf16.msra.mxu1 %v3639_v37 }
 0x2db   : > { %3381 = vmatprep.subr.bf16.mxu1 %v3740_v1 }
 0x2dc   : > { %3404 = vmatpush3.bf16.msra.mxu0 %v3640_v54  ;;  %v3653_v54 = vld [vmem:[%s4651_s10 + $0x90] sm:$0xff]  }
 0x2dd   : > { %3405 = vmatprep.subr.bf16.mxu0 %v3740_v1 }
 0x2de   : > { %3382 = vmatpush3.bf16.msra.mxu1 %v3641_v55  ;;  %v3654_v55 = vld [vmem:[%s4651_s10 + $0x98] sm:$0xff]  }
 0x2df   : > { %3383 = vmatprep.subr.bf16.mxu1 %v3740_v1 }
 0x2e0   : > { %3406 = vmatpush3.bf16.msra.mxu0 %v3642_v57  ;;  %v3655_v57 = vld [vmem:[%s4651_s10 + $0xa0] sm:$0xff]  }
 0x2e1   : > { %3407 = vmatprep.subr.bf16.mxu0 %v3740_v1 }
 0x2e2   : > { %3384 = vmatpush3.bf16.msra.mxu1 %v3643_v58  ;;  %v3656_v58 = vld [vmem:[%s4651_s10 + $0xa8] sm:$0xff]  }
 0x2e3   : > { %3385 = vmatprep.subr.bf16.mxu1 %v3740_v1 }
 0x2e4   : > { %3408 = vmatpush3.bf16.msra.mxu0 %v3644_v59  ;;  %v3657_v59 = vld [vmem:[%s4651_s10 + $0xb0] sm:$0xff]  }
 0x2e5   : > { %3409 = vmatprep.subr.bf16.mxu0 %v3740_v1 }
 0x2e6   : > { %3386 = vmatpush3.bf16.msra.mxu1 %v3645_v60  ;;  %v3658_v60 = vld [vmem:[%s4651_s10 + $0xb8] sm:$0xff]  }
 0x2e7   : > { %3387 = vmatprep.subr.bf16.mxu1 %v3740_v1 }
 0x2e8   : > { %3410 = vmatpush3.bf16.msra.mxu0 %v3646_v62 }
 0x2e9   : > { %3411 = vmatprep.subr.bf16.mxu0 %v3740_v1 }
 0x2ea   : > { %3388 = vmatpush3.bf16.msra.mxu1 %v3647_v63  ;;  %v3659_v63 = vld [vmem:[%s4653_s12] sm:$0xff]  }
 0x2eb   : > { %3389 = vmatprep.subr.bf16.mxu1 %v3740_v1 }
 0x2ec   : > { %3412 = vmatpush3.bf16.msra.mxu0 %v3648_v0  ;;  %v3661_v0 = vld [vmem:[%s4653_s12 + $0x40] sm:$0xff]  }
 0x2ed   : > { %3437 = vmatprep.subr.bf16.mxu0 %v3740_v1 }
 0x2ee   : > { %3390 = vmatpush3.bf16.msra.mxu1 %v3649_v2  ;;  %v3660_v2 = vld [vmem:[%s4653_s12 + $0x8] sm:$0xff]  }
 0x2ef   : > { %3391 = vmatprep.subr.bf16.mxu1 %v3740_v1 }
 0x2f2   : > { %3392 = vmatpush3.bf16.msra.mxu1 %v3650_v3  ;;  %v3663_v3 = vld [vmem:[%s4653_s12 + $0x48] sm:$0xff]  }
 0x2f3   : > { %3417 = vmatprep.subr.bf16.mxu1 %v3740_v1 }
 0x362   : > { %v1077_v4 = vpop.f32.mrb[16].mxu0 }
 0x363   : > { %v3295_v5 = vpop.f32.mrb[17].mxu0 }
 0x364   : > { %v1080_v6 = vpop.f32.mrb[18].mxu0  ;;  %v3665_v5 = vld [vmem:[%s4653_s12 + $0x50] sm:$0xff]  }
 0x365   : > { %v3296_v7 = vpop.f32.mrb[19].mxu0 }
 0x366   : > { %v3667_v7 = vld [vmem:[%s4653_s12 + $0x58] sm:$0xff]  }
 0x368   : > { %v988_v8 = vpop.f32.mrb[12].mxu1 }
 0x369   : > { %v1078_v9 = vadd.f32 %v1077_v4, %v988_v8  ;;  %v3275_v10 = vpop.f32.mrb[13].mxu1  ;;  %v3662_v4 = vld [vmem:[%s4653_s12 + $0x10] sm:$0xff]   ;;  %v3666_v8 = vld [vmem:[%s4653_s12 + $0x20] sm:$0xff]  }
 0x36a   : > { %v991_v11 = vpop.f32.mrb[14].mxu1  ;;  %v3669_v10 = vld [vmem:[%s4653_s12 + $0x60] sm:$0xff]  }
 0x36b   : > { %v1081_v12 = vadd.f32 %v1080_v6, %v991_v11  ;;  %v3276_v13 = vpop.f32.mrb[15].mxu1  ;;  %v3664_v6 = vld [vmem:[%s4653_s12 + $0x18] sm:$0xff]   ;;  %v3670_v11 = vld [vmem:[%s4653_s12 + $0x30] sm:$0xff]  }
 0x36c   : > { %v3672_v13 = vld [vmem:[%s4653_s12 + $0x38] sm:$0xff]  }
 0x382   : > { %v1330_v14 = vpop.f32.mrb[20].mxu0 }
 0x383   : > { %v3335_v15 = vpop.f32.mrb[21].mxu0 }
 0x384   : > { %v1333_v16 = vpop.f32.mrb[22].mxu0  ;;  %v3674_v15 = vld [vmem:[%s4655_s14 + $0x40] sm:$0xff]  }
 0x385   : > { %v3336_v17 = vpop.f32.mrb[23].mxu0 }
 0x388   : > { %v1186_v18 = vpop.f32.mrb[16].mxu1 }
 0x389   : > { %v1193_v19 = vadd.f32 %v1186_v18, %v1078_v9  ;;  %v3315_v21 = vpop.f32.mrb[17].mxu1  ;;  %v3668_v9 = vld [vmem:[%s4653_s12 + $0x28] sm:$0xff]  }
 0x38a   : > { %v1189_v22 = vpop.f32.mrb[18].mxu1 }
 0x38b   : > { %v1194_v23 = vadd.f32 %v1189_v22, %v1081_v12  ;;  %v3316_v24 = vpop.f32.mrb[19].mxu1  ;;  %v1202_v25 = vadd.f32 %v2719_v20, %v1193_v19  ;;  %v3671_v12 = vld [vmem:[%s4653_s12 + $0x68] sm:$0xff]  }
 0x38d   : > { %v1203_v26 = vadd.f32 %v2719_v20, %v1194_v23  ;;  %v1204_v28 = vmax.f32 %v1202_v25, 0.0 }
 0x38f   : > { %v1205_v27 = vmax.f32 %v1203_v26, 0.0 }
 0x391   : > { %v1207_v29 = vsel %vm1206_vm5, %v1205_v27, -inf }
 0x392   : > { %v4385_v30 = vmax.f32 %v1204_v28, %v1207_v29 }
 0x394   : > { %v1209_v27 = vrot.slane %v4385_v30, 4 }
 0x396   : > { %v1210_v28 = vmax.f32 %v4385_v30, %v1209_v27  ;;  %v3675_v30 = vld [vmem:[%s4655_s14] sm:$0xff]  }
 0x398   : > { %v1211_v29 = vrot.slane %v1210_v28, 2 }
 0x3a2   : > { %v1525_v31 = vpop.f32.mrb[24].mxu0 }
 0x3a3   : > { %v3375_v32 = vpop.f32.mrb[25].mxu0 }
 0x3a4   : > { %v1528_v33 = vpop.f32.mrb[26].mxu0 }
 0x3a5   : > { %v3376_v34 = vpop.f32.mrb[27].mxu0 }
 0x3a8   : > { %v1419_v35 = vpop.f32.mrb[20].mxu1 }
 0x3a9   : > { %v1420_v36 = vadd.f32 %v1419_v35, %v1330_v14  ;;  %v3355_v44 = vpop.f32.mrb[21].mxu1  ;;  %v3673_v14 = vld [vmem:[%s4653_s12 + $0x70] sm:$0xff]  }
 0x3aa   : > { %v1422_v39 = vpop.f32.mrb[22].mxu1 }
 0x3ab   : > { %v1532_v40 = vadd.f32 %v1525_v31, %v1420_v36  ;;  %v1423_v41 = vadd.f32 %v1422_v39, %v1333_v16  ;;  %v3356_v42 = vpop.f32.mrb[23].mxu1  ;;  %v3676_v16 = vld [vmem:[%s4653_s12 + $0x78] sm:$0xff]   ;;  %v1212_v31 = vmax.f32 %v1210_v28, %v1211_v29 }
 0x3ad   : > { %v1541_v43 = vadd.f32 %v2776_v38, %v1532_v40  ;;  %v1533_v45 = vadd.f32 %v1528_v33, %v1423_v41  ;;  %v2833_v33 = vld [vmem:[%s4652_s11] ss:$0 sm:$0xff]  ;;  %v1213_v44 = vrot.slane %v1212_v31, 1 }
 0x3af   : > { %v1542_v46 = vadd.f32 %v2776_v38, %v1533_v45  ;;  %v1543_v47 = vmax.f32 %v1541_v43, 0.0  ;;  %v1214_v42 = vmax.f32 %v1212_v31, %v1213_v44 }
 0x3b1   : > { %v1544_v48 = vmax.f32 %v1542_v46, 0.0 }
 0x3b3   : > { %v1545_v49 = vpack.c.bf16 %v1544_v48, %v1543_v47  ;;  %v3677_v47 = vld [vmem:[%s4655_s14 + $0x48] sm:$0xff]   ;;  %v2239_v48 = vpack.c.bf16 %v1214_v42, %v1214_v42 }
 0x3b5   : > { %3414 = vmatmul.mubr.bf16.vlgmr.msra.gmra.mrb[28].mxu0 %v1545_v49  ;;  %v1582_v50 = vshll.u32 %v1545_v49, 16  ;;  %v1580_v51 = vshrl.u32 %v1545_v49, 16  ;;  %v1783_v62 = vrot.slane %v1545_v49, 1 }
 0x3b6   : > { %3453 = vmatprep.mubr.msk.bf16.mxu0 %vm3741_vm0, %v3740_v1  ;;  %3438 = vmatpush3.bf16.msra.mxu0 %v3661_v0  ;;  %v3687_v0 = vld [vmem:[%s4655_s14 + $0x20] sm:$0xff]  }
 0x3b7   : > { %v1584_v61 = vrot.slane %v1582_v50, 1  ;;  %3439 = vmatprep.subr.bf16.mxu0 %v3740_v1  ;;  %v3678_v50 = vld [vmem:[%s4655_s14 + $0x8] sm:$0xff]  }
 0x3b9   : > { %v1585_v37 = vor.u32 %v1584_v61, %v1580_v51 }
 0x3ba   : > { %3440 = vmatpush3.bf16.msra.mxu0 %v3663_v3  ;;  %v3688_v3 = vld [vmem:[%s4653_s12 + $0x98] sm:$0xff]  }
 0x3bb   : > { %3394 = vmatmul.mubr.bf16.vlgmr.msra.gmra.mrb[24].mxu1 %v1585_v37  ;;  %3441 = vmatprep.subr.bf16.mxu0 %v3740_v1  ;;  %v3679_v37 = vld [vmem:[%s4653_s12 + $0x80] sm:$0xff]  }
 0x3bc   : > { %3418 = vmatpush3.bf16.msra.mxu1 %v3651_v52  ;;  %3433 = vmatprep.mubr.msk.bf16.mxu1 %vm3741_vm0, %v3740_v1  ;;  %v3680_v52 = vld [vmem:[%s4655_s14 + $0x50] sm:$0xff]  }
 0x3bd   : > { %3419 = vmatprep.subr.bf16.mxu1 %v3740_v1 }
 0x3be   : > { %3442 = vmatpush3.bf16.msra.mxu0 %v3665_v5  ;;  %v3692_v5 = vld [vmem:[%s4655_s14 + $0x70] sm:$0xff]  }
 0x3bf   : > { %3443 = vmatprep.subr.bf16.mxu0 %v3740_v1 }
 0x3c0   : > { %3420 = vmatpush3.bf16.msra.mxu1 %v3652_v53 }
 0x3c1   : > { %3421 = vmatprep.subr.bf16.mxu1 %v3740_v1 }
 0x3c2   : > { %3444 = vmatpush3.bf16.msra.mxu0 %v3667_v7  ;;  %v3691_v7 = vld [vmem:[%s4653_s12 + $0xa0] sm:$0xff]  }
 0x3c3   : > { %3445 = vmatprep.subr.bf16.mxu0 %v3740_v1 }
 0x3c4   : > { %3422 = vmatpush3.bf16.msra.mxu1 %v3653_v54  ;;  %v3681_v54 = vld [vmem:[%s4655_s14 + $0x10] sm:$0xff]  }
 0x3c5   : > { %3423 = vmatprep.subr.bf16.mxu1 %v3740_v1 }
 0x3c6   : > { %3446 = vmatpush3.bf16.msra.mxu0 %v3669_v10 }
 0x3c7   : > { %3447 = vmatprep.subr.bf16.mxu0 %v3740_v1 }
 0x3c8   : > { %3424 = vmatpush3.bf16.msra.mxu1 %v3654_v55  ;;  %v528_v55 = vrot.slane %v4164_v56, 4 }
 0x3c9   : > { %3425 = vmatprep.subr.bf16.mxu1 %v3740_v1 }
 0x3ca   : > { %3448 = vmatpush3.bf16.msra.mxu0 %v3671_v12  ;;  %v3696_v12 = vld [vmem:[%s4655_s14 + $0x38] sm:$0xff]  }
 0x3cb   : > { %3449 = vmatprep.subr.bf16.mxu0 %v3740_v1 }
 0x3cc   : > { %3426 = vmatpush3.bf16.msra.mxu1 %v3655_v57  ;;  %v3683_v57 = vld [vmem:[%s4655_s14 + $0x58] sm:$0xff]  }
 0x3cd   : > { %3427 = vmatprep.subr.bf16.mxu1 %v3740_v1 }
 0x3ce   : > { %3450 = vmatpush3.bf16.msra.mxu0 %v3673_v14  ;;  %v3697_v14 = vld [vmem:[%s4653_s12 + $0xb0] sm:$0xff]  }
 0x3cf   : > { %3451 = vmatprep.subr.bf16.mxu0 %v3740_v1 }
 0x3d0   : > { %3428 = vmatpush3.bf16.msra.mxu1 %v3656_v58  ;;  %v3682_v58 = vld [vmem:[%s4653_s12 + $0x88] sm:$0xff]  }
 0x3d1   : > { %3429 = vmatprep.subr.bf16.mxu1 %v3740_v1 }
 0x3d2   : > { %3452 = vmatpush3.bf16.msra.mxu0 %v3676_v16  ;;  %v3698_v16 = vld [vmem:[%s4653_s12 + $0xb8] sm:$0xff]  }
 0x3d3   : > { %3477 = vmatprep.subr.bf16.mxu0 %v3740_v1 }
 0x3d4   : > { %3430 = vmatpush3.bf16.msra.mxu1 %v3657_v59  ;;  %v3684_v59 = vld [vmem:[%s4655_s14 + $0x18] sm:$0xff]  }
 0x3d5   : > { %3431 = vmatprep.subr.bf16.mxu1 %v3740_v1 }
 0x3d8   : > { %3432 = vmatpush3.bf16.msra.mxu1 %v3658_v60  ;;  %v529_v60 = vmax.f32 %v4164_v56, %v528_v55  ;;  %v3689_v56 = vld [vmem:[%s4655_s14 + $0x68] sm:$0xff]  }
 0x3d9   : > { %3457 = vmatprep.subr.bf16.mxu1 %v3740_v1 }
 0x3db   : > { %3434 = vmatmul.mubr.bf16.vlgmr.msra.gmra.mrb[28].mxu1 %v1783_v62  ;;  %v3686_v62 = vld [vmem:[%s4655_s14 + $0x60] sm:$0xff]  }
 0x3dc   : > { %3473 = vmatprep.mubr.msk.bf16.mxu1 %vm3741_vm0, %v3740_v1  ;;  %3458 = vmatpush3.bf16.msra.mxu1 %v3659_v63  ;;  %v3685_v63 = vld [vmem:[%s4653_s12 + $0x90] sm:$0xff]  }
 0x3dd   : > { %3459 = vmatprep.subr.bf16.mxu1 %v3740_v1 }
 0x3e0   : > { %3460 = vmatpush3.bf16.msra.mxu1 %v3660_v2  ;;  %v530_v2 = vrot.slane %v529_v60, 2 }
 0x3e1   : > { %3461 = vmatprep.subr.bf16.mxu1 %v3740_v1 }
 0x3e4   : > { %3462 = vmatpush3.bf16.msra.mxu1 %v3662_v4  ;;  %v3690_v4 = vld [vmem:[%s4655_s14 + $0x28] sm:$0xff]  }
 0x3e5   : > { %3463 = vmatprep.subr.bf16.mxu1 %v3740_v1 }
 0x3e8   : > { %3464 = vmatpush3.bf16.msra.mxu1 %v3664_v6  ;;  %v531_v6 = vmax.f32 %v529_v60, %v530_v2  ;;  %v2289_v60 = vld [vmem:[%s4656_s15] sm:$0x1] }
 0x3e9   : > { %3465 = vmatprep.subr.bf16.mxu1 %v3740_v1 }
 0x3ea   : > { %v532_v10 = vrot.slane %v531_v6, 1 }
 0x3ec   : > { %3466 = vmatpush3.bf16.msra.mxu1 %v3666_v8  ;;  %v3693_v8 = vld [vmem:[%s4655_s14 + $0x30] sm:$0xff]  }
 0x3ed   : > { %3467 = vmatprep.subr.bf16.mxu1 %v3740_v1 }
 0x3f0   : > { %3468 = vmatpush3.bf16.msra.mxu1 %v3668_v9  ;;  %v3695_v9 = vld [vmem:[%s4655_s14 + $0x78] sm:$0xff]  }
 0x3f1   : > { %3469 = vmatprep.subr.bf16.mxu1 %v3740_v1 }
 0x3f4   : > { %3470 = vmatpush3.bf16.msra.mxu1 %v3670_v11  ;;  %v3694_v11 = vld [vmem:[%s4653_s12 + $0xa8] sm:$0xff]  }
 0x3f5   : > { %3471 = vmatprep.subr.bf16.mxu1 %v3740_v1 }
 0x3f8   : > { %3472 = vmatpush3.bf16.msra.mxu1 %v3672_v13  ;;  %v533_v13 = vmax.f32 %v531_v6, %v532_v10 }
 0x3f9   : > { %3086 = vmatprep.subr.bf16.mxu1 %v3674_v15 }
 0x3fa   : > { %v2238_v15 = vpack.c.bf16 %v533_v13, %v533_v13 }
 0x488   : > { %v1758_v17 = vpop.f32.mrb[28].mxu0 }
 0x489   : > { %v3415_v18 = vpop.f32.mrb[29].mxu0 }
 0x48a   : > { %v1761_v19 = vpop.f32.mrb[30].mxu0  ;;  %v3699_v18 = vld [vmem:[%s4655_s14 + $0x80] sm:$0xff]  }
 0x48b   : > { %v3416_v20 = vpop.f32.mrb[31].mxu0 }
 0x48c   : > { %v3701_v20 = vld [vmem:[%s4655_s14 + $0x90] sm:$0xff]  }
 0x48e   : > { %v1669_v21 = vpop.f32.mrb[24].mxu1 }
 0x48f   : > { %v1759_v22 = vadd.f32 %v1758_v17, %v1669_v21  ;;  %v3395_v23 = vpop.f32.mrb[25].mxu1  ;;  %v3702_v21 = vld [vmem:[%s4655_s14 + $0x98] sm:$0xff]  }
 0x490   : > { %v1672_v24 = vpop.f32.mrb[26].mxu1  ;;  %v3704_v23 = vld [vmem:[%s4655_s14 + $0xa8] sm:$0xff]  }
 0x491   : > { %v1762_v25 = vadd.f32 %v1761_v19, %v1672_v24  ;;  %v3396_v26 = vpop.f32.mrb[27].mxu1  ;;  %v3700_v19 = vld [vmem:[%s4655_s14 + $0x88] sm:$0xff]   ;;  %v3705_v24 = vld [vmem:[%s4655_s14 + $0xb0] sm:$0xff]  }
 0x4ae   : > { %v1867_v32 = vpop.f32.mrb[28].mxu1 }
 0x4af   : > { %v1874_v34 = vadd.f32 %v1867_v32, %v1759_v22  ;;  %v3435_v35 = vpop.f32.mrb[29].mxu1  ;;  %v3703_v22 = vld [vmem:[%s4655_s14 + $0xa0] sm:$0xff]  }
 0x4b0   : > { %v1870_v36 = vpop.f32.mrb[30].mxu1 }
 0x4b1   : > { %v1883_v38 = vadd.f32 %v2833_v33, %v1874_v34  ;;  %v1875_v39 = vadd.f32 %v1870_v36, %v1762_v25  ;;  %v3436_v40 = vpop.f32.mrb[31].mxu1  ;;  %v3706_v25 = vld [vmem:[%s4655_s14 + $0xb8] sm:$0xff]  }
 0x4b3   : > { %v1884_v41 = vadd.f32 %v2833_v33, %v1875_v39  ;;  %v1885_v43 = vmax.f32 %v1883_v38, 0.0 }
 0x4b5   : > { %v1886_v45 = vmax.f32 %v1884_v41, 0.0 }
 0x4b7   : > { %v4502_v46 = vpack.c.bf16 %v1886_v45, %v1885_v43 }
 0x4b9   : > { %3474 = vmatmul.mubr.bf16.vlgmr.msra.gmra.mrb[32].mxu1 %v4502_v46  ;;  %v1924_v49 = vshll.u32 %v4502_v46, 16  ;;  %v1922_v51 = vshrl.u32 %v4502_v46, 16  ;;  %v2125_v17 = vrot.slane %v4502_v46, 1 }
 0x4ba   : > { %3087 = vmatpush3.bf16.msra.mxu1 %v3675_v30  ;;  %2466 = vmatprep.mubr.bf16.mxu1 %v2239_v48 }
 0x4bb   : > { %3088 = vmatprep.subr.bf16.mxu1 %v3677_v47  ;;  %v1926_v61 = vrot.slane %v1924_v49, 1 }
 0x4bd   : > { %v1927_v53 = vor.u32 %v1926_v61, %v1922_v51 }
 0x4be   : > { %3089 = vmatpush3.bf16.msra.mxu1 %v3678_v50 }
 0x4bf   : > { %3454 = vmatmul.mubr.bf16.vlgmr.msra.gmra.mrb[32].mxu0 %v1927_v53  ;;  %3090 = vmatprep.subr.bf16.mxu1 %v3680_v52 }
 0x4c0   : > { %3478 = vmatpush3.bf16.msra.mxu0 %v3679_v37  ;;  %3493 = vmatprep.mubr.msk.bf16.mxu0 %vm3741_vm0, %v3740_v1 }
 0x4c1   : > { %3479 = vmatprep.subr.bf16.mxu0 %v3740_v1 }
 0x4c2   : > { %3091 = vmatpush3.bf16.msra.mxu1 %v3681_v54 }
 0x4c3   : > { %3092 = vmatprep.subr.bf16.mxu1 %v3683_v57 }
 0x4c4   : > { %3480 = vmatpush3.bf16.msra.mxu0 %v3682_v58 }
 0x4c5   : > { %3481 = vmatprep.subr.bf16.mxu0 %v3740_v1 }
 0x4c6   : > { %3093 = vmatpush3.bf16.msra.mxu1 %v3684_v59 }
 0x4c7   : > { %3094 = vmatprep.subr.bf16.mxu1 %v3686_v62 }
 0x4c8   : > { %3482 = vmatpush3.bf16.msra.mxu0 %v3685_v63 }
 0x4c9   : > { %3483 = vmatprep.subr.bf16.mxu0 %v3740_v1 }
 0x4ca   : > { %3095 = vmatpush3.bf16.msra.mxu1 %v3687_v0 }
 0x4cb   : > { %3096 = vmatprep.subr.bf16.mxu1 %v3689_v56 }
 0x4cc   : > { %3484 = vmatpush3.bf16.msra.mxu0 %v3688_v3 }
 0x4cd   : > { %3485 = vmatprep.subr.bf16.mxu0 %v3740_v1 }
 0x4ce   : > { %3097 = vmatpush3.bf16.msra.mxu1 %v3690_v4 }
 0x4cf   : > { %3098 = vmatprep.subr.bf16.mxu1 %v3692_v5 }
 0x4d0   : > { %3486 = vmatpush3.bf16.msra.mxu0 %v3691_v7 }
 0x4d1   : > { %3487 = vmatprep.subr.bf16.mxu0 %v3740_v1 }
 0x4d2   : > { %3099 = vmatpush3.bf16.msra.mxu1 %v3693_v8 }
 0x4d3   : > { %3100 = vmatprep.subr.bf16.mxu1 %v3695_v9 }
 0x4d4   : > { %3488 = vmatpush3.bf16.msra.mxu0 %v3694_v11 }
 0x4d5   : > { %3489 = vmatprep.subr.bf16.mxu0 %v3740_v1 }
 0x4d6   : > { %3101 = vmatpush3.bf16.msra.mxu1 %v3696_v12 }
 0x4d8   : > { %3490 = vmatpush3.bf16.msra.mxu0 %v3697_v14 }
 0x4d9   : > { %2467 = vmatmul.mubr.bf16.vlgmr.msra.gmra.mrb[36].mxu1 %v2238_v15  ;;  %3491 = vmatprep.subr.bf16.mxu0 %v3740_v1 }
 0x4dc   : > { %3492 = vmatpush3.bf16.msra.mxu0 %v3698_v16 }
 0x4dd   : > { %3497 = vmatprep.subr.bf16.mxu0 %v3740_v1 }
 0x4df   : > { %3494 = vmatmul.mubr.bf16.vlgmr.msra.gmra.mrb[36].mxu0 %v2125_v17 }
 0x4e0   : > { %3513 = vmatprep.mubr.msk.bf16.mxu0 %vm3741_vm0, %v3740_v1  ;;  %3498 = vmatpush3.bf16.msra.mxu0 %v3699_v18 }
 0x4e1   : > { %3499 = vmatprep.subr.bf16.mxu0 %v3740_v1 }
 0x4e4   : > { %3500 = vmatpush3.bf16.msra.mxu0 %v3700_v19 }
 0x4e5   : > { %3501 = vmatprep.subr.bf16.mxu0 %v3740_v1 }
 0x4e8   : > { %3502 = vmatpush3.bf16.msra.mxu0 %v3701_v20 }
 0x4e9   : > { %3503 = vmatprep.subr.bf16.mxu0 %v3740_v1 }
 0x4ec   : > { %3504 = vmatpush3.bf16.msra.mxu0 %v3702_v21 }
 0x4ed   : > { %3505 = vmatprep.subr.bf16.mxu0 %v3740_v1 }
 0x4f0   : > { %3506 = vmatpush3.bf16.msra.mxu0 %v3703_v22 }
 0x4f1   : > { %3507 = vmatprep.subr.bf16.mxu0 %v3740_v1 }
 0x4f4   : > { %3508 = vmatpush3.bf16.msra.mxu0 %v3704_v23 }
 0x4f5   : > { %3509 = vmatprep.subr.bf16.mxu0 %v3740_v1 }
 0x4f8   : > { %3510 = vmatpush3.bf16.msra.mxu0 %v3705_v24 }
 0x4f9   : > { %3511 = vmatprep.subr.bf16.mxu0 %v3740_v1  ;;  %v2890_v1 = vld [vmem:[%s4654_s13] ss:$0 sm:$0xff] }
 0x4fc   : > { %3512 = vmatpush3.bf16.msra.mxu0 %v3706_v25 }
 0x58c   : > { %v2100_v26 = vpop.f32.mrb[32].mxu1 }
 0x58d   : > { %v3475_v27 = vpop.f32.mrb[33].mxu1 }
 0x58e   : > { %v2103_v28 = vpop.f32.mrb[34].mxu1 }
 0x58f   : > { %v3476_v29 = vpop.f32.mrb[35].mxu1 }
 0x592   : > { %v2011_v31 = vpop.f32.mrb[32].mxu0 }
 0x593   : > { %v2101_v32 = vadd.f32 %v2100_v26, %v2011_v31  ;;  %v3455_v33 = vpop.f32.mrb[33].mxu0 }
 0x594   : > { %v2014_v34 = vpop.f32.mrb[34].mxu0 }
 0x595   : > { %v2104_v35 = vadd.f32 %v2103_v28, %v2014_v34  ;;  %v3456_v36 = vpop.f32.mrb[35].mxu0 }
 0x5ac   : > { %v3102_v44 = vpop.f32.mrb[36].mxu1 }
 0x5ad   : > { %v3103_v38 = vpop.f32.mrb[37].mxu1 }
 0x5ae   : > { %v3104_v39 = vadd.f32 %v3103_v38, %v3102_v44  ;;  %v3105_v40 = vpop.f32.mrb[38].mxu1 }
 0x5af   : > { %v3106_v41 = vpop.f32.mrb[39].mxu1 }
 0x5b0   : > { %v2469_v62 = vadd.f32 %v3104_v39, %v2289_v60 }
 0x5b2   : > { %v2209_v42 = vpop.f32.mrb[36].mxu0 }
 0x5b3   : > { %v2216_v43 = vadd.f32 %v2209_v42, %v2101_v32  ;;  %v3495_v45 = vpop.f32.mrb[37].mxu0 }
 0x5b4   : > { %v2212_v30 = vpop.f32.mrb[38].mxu0 }
 0x5b5   : > { %v2217_v46 = vadd.f32 %v2212_v30, %v2104_v35  ;;  %v3496_v47 = vpop.f32.mrb[39].mxu0  ;;  %v2225_v48 = vadd.f32 %v2890_v1, %v2216_v43 }
 0x5b7   : > { %v2226_v49 = vadd.f32 %v2890_v1, %v2217_v46  ;;  %v2227_v51 = vmax.f32 %v2225_v48, 0.0 }
 0x5b9   : > { %v2228_v50 = vmax.f32 %v2226_v49, 0.0 }
 0x5bb   : > { %v2230_v61 = vsel %vm2229_vm6, %v2228_v50, -inf }
 0x5bc   : > { %v2231_v52 = vmax.f32 %v2227_v51, %v2230_v61 }
 0x5be   : > { %v2232_v37 = vrot.slane %v2231_v52, 4 }
 0x5c0   : > { %v2233_v53 = vmax.f32 %v2231_v52, %v2232_v37 }
 0x5c2   : > { %v2234_v54 = vrot.slane %v2233_v53, 2 }
 0x5c4   : > { %v2235_v55 = vmax.f32 %v2233_v53, %v2234_v54 }
 0x5c6   : > { %v2236_v57 = vrot.slane %v2235_v55, 1 }
 0x5c8   : > { %v2237_v58 = vmax.f32 %v2235_v55, %v2236_v57 }
 0x5ca   : > { %v2240_v59 = vpack.c.bf16 %v2237_v58, %v2237_v58 }
 0x5cc   : > { %3514 = vmatmul.mubr.bf16.vlgmr.msra.gmra.mrb[40].mxu0 %v2240_v59 }
 0x69c   :  { %59 = sbr.rel (!%p57_p0) target bundleno = 3 (0x3), region = 105 }
 0x69f   : > { %v2508_v63 = vpop.f32.mrb[40].mxu0 }
 0x6a0   : > { %v2509_v0 = vadd.f32 %v2508_v63, %v2469_v62  ;;  %v3515_v2 = vpop.f32.mrb[41].mxu0 }
 0x6a1   : > { %v2511_v56 = vpop.f32.mrb[42].mxu0 }
 0x6a2   : > { %2515 = vst [vmem:[%s2514_s29] sm:$0x1] %v2509_v0  ;;  %v3516_v3 = vpop.f32.mrb[43].mxu0 }
 0x6a3   :  { %3718 = shalt.err (!%p3715_p5)
}
 0x6a4   :  { %s3719_s20 = scalar_lea.hbm %s4657_s16, 32 }
 0x6a5   :  { %p3720_p6 = scmp.ne.s32.totalorder %s4657_s16, %s3719_s20  ;;  %p3723_p7 = scmp.lt.u32.totalorder %s3719_s20, %s4657_s16 }
 0x6a7   :  { %p3725_p8 = pnand %p3723_p7, %p3720_p6 }
 0x6a9   :  { %3728 = shalt.err (!%p3725_p8)
}
 0x6aa   :  { %2525 = dma.vmem_to_hbm [thread:$0]  %s2523_s0, 32, %s4657_s16, [#allocation3]  }
 0x6ab   :  { %3733 = dma.done.wait [#allocation3], 32  }
 0x6ac   :  { %3734 = vsyncadd [#allocation3], 4294967264 }
 0x6ad   :  { %2529 = vsyncpa [#allocation3], 1 }

</bundles_post_ra>
